<compile_context>
chip_gen: v7x
topology: tpu7x:2x2x1
jax: 0.10.0
libtpu: 0.0.40
codegen_flags: <defaults>
</compile_context>

<pallas_src>
import math
from functools import partial

import jax
import jax.numpy as jnp
from jax.experimental import pallas as pl
from jax.experimental.pallas import tpu as pltpu


# ------------------------------ small helpers --------------------------------

def _round_up(n, m):
    return ((n + m - 1) // m) * m


_INV_SQRT2 = 1.0 / math.sqrt(2.0)


def _gelu(x, approximate):
    if approximate:
        # tanh formulation -> EUP slot (frees the VALU); small numerics
        # deviation from PyTorch's default exact-erf GELU.
        return jax.nn.gelu(x, approximate=True)
    return 0.5 * x * (1.0 + jax.lax.erf(x * _INV_SQRT2))


# --------------------------------- kernel ------------------------------------

def _vda_kernel(x_ref,
                w1_ref, b1_ref, g_ref, be_ref,     # fused first layer + LN affine  [D,4Hp]/[1,4Hp]
                pw2_ref, pb2_ref,                  # position head 2nd layer        [Hp,128]/[1,128]
                w2r_ref, b2r_ref,                  # region 2nd layers              [3,Hp,Vp]/[3,1,Vp]
                wf_ref, bf_ref,                    # output fusion                  [3,Vp,Vp]/[1,Vp]
                out_ref,                           # [tm, V]
                *, H, Hp, V, Vp, gelu_approx):
    tm = x_ref.shape[0]

    # Single cast to bf16 in-kernel (no wrapper-side astype / extra HBM pass).
    xb = x_ref[...].astype(jnp.bfloat16)                                   # [tm, D]

    # ---- fused first layer: one MXU pass with N = 4*Hp (pad columns are 0) ----
    h = jnp.dot(xb, w1_ref[...], preferred_element_type=jnp.float32) + b1_ref[...]  # [tm, 4Hp]

    inv_h = 1.0 / H

    def ln_gelu(i):
        # Per-branch LayerNorm (true-H statistics) + GELU.  Slice offsets are
        # multiples of Hp (multiple of 128) -> aligned, free views.
        blk = h[:, i * Hp:(i + 1) * Hp]
        g = g_ref[:, i * Hp:(i + 1) * Hp]
        be = be_ref[:, i * Hp:(i + 1) * Hp]
        mu = jnp.sum(blk, axis=-1, keepdims=True) * inv_h        # pads are exactly 0
        if Hp == H:
            xc = blk - mu
            var = jnp.sum(xc * xc, axis=-1, keepdims=True) * inv_h
            y = xc * jax.lax.rsqrt(var + 1e-5)
        else:
            # E[x^2] - mu^2 with true-H divisor (zero pad lanes contribute 0 to
            # both sums); gamma/beta are 0 on pad lanes so they stay exactly 0.
            var = jnp.sum(blk * blk, axis=-1, keepdims=True) * inv_h - mu * mu
            var = jnp.maximum(var, 0.0)
            y = (blk - mu) * jax.lax.rsqrt(var + 1e-5)
        return _gelu(y * g + be, gelu_approx)                    # [tm, Hp] f32, pads 0

    # ---- position head -> softmax over 3 (lane-padded to 128, pad bias -1e30) ----
    hp = ln_gelu(0).astype(jnp.bfloat16)                                   # [tm, Hp]
    pos_logits = (jnp.dot(hp, pw2_ref[...], preferred_element_type=jnp.float32)
                  + pb2_ref[...])                                          # [tm, 128]
    m = jnp.max(pos_logits, axis=-1, keepdims=True)
    e = jnp.exp(pos_logits - m)                                            # pad lanes -> 0
    pos_w = e * pl.reciprocal(jnp.sum(e, axis=-1, keepdims=True), approx=True)

    # ---- region branches; weighting folded in before the fusion matmuls ----
    # pos_w_i * (reg_i @ wf_i) == (pos_w_i * reg_i) @ wf_i, so the fusion is
    # three accumulating [tm,Vp]@[Vp,Vp] matmuls; nothing is re-concatenated.
    acc = jnp.zeros((tm, Vp), jnp.float32)
    for i in range(3):                                                     # static unroll
        hr = ln_gelu(i + 1).astype(jnp.bfloat16)                           # [tm, Hp]
        reg = (jnp.dot(hr, w2r_ref[i], preferred_element_type=jnp.float32)
               + b2r_ref[i])                                               # [tm, Vp]
        weighted = (pos_w[:, i:i + 1] * reg).astype(jnp.bfloat16)          # [tm, Vp]
        acc = acc + jnp.dot(weighted, wf_ref[i], preferred_element_type=jnp.float32)
    out = acc + bf_ref[...]                                                # [tm, Vp]

    # Only the first V lanes are real: store them directly (output array is
    # [M, V]; no padded HBM writeback + wrapper slice pass).
    out_ref[...] = out[:, :V].astype(out_ref.dtype)


# -------------------------------- wrapper -------------------------------------

def _const_spec(shape, buffer_count=None):
    """Full-array (untiled) parameter block; block index never changes."""
    n = len(shape)
    index_map = lambda i, _n=n: (0,) * _n
    if buffer_count is None:
        return pl.BlockSpec(shape, index_map)
    # e.g. buffer_count=1 single-buffers the constants on VMEM-tight chips (v7x).
    return pl.BlockSpec(shape, index_map, pipeline_mode=pl.Buffered(buffer_count))


def visual_diacritic_attention(features, packed, *, tm=512, gelu_approx=True,
                               param_buffer_count=None):
    """features: [B, S, D] (any float dtype).  packed: output of pack_params().

    tm: row-tile size; sweep 256/512/1024 on v5e/v6e (128 MiB VMEM).  On v7x
    (64 MiB VMEM, 2 TensorCores) keep the grid >= 2 (ideally even) steps and
    consider param_buffer_count=1 to single-buffer the constant params.
    gelu_approx=False restores exact-erf PyTorch GELU parity (slower: VALU).
    """
    B, S, D = features.shape
    V, Vp, H, Hp = packed["V"], packed["Vp"], packed["H"], packed["Hp"]
    M = B * S

    x = features.reshape(M, D)                        # no dtype cast in the wrapper

    tm_eff = min(tm, _round_up(M, 8))
    steps = pl.cdiv(M, tm_eff)
    # Give both v7x TensorCores work when a single tile would otherwise hold
    # everything but there is enough to split.
    # TODO(synk): use pltpu.get_tpu_info() to force an even step count only on
    # multi-TensorCore parts instead of this heuristic.
    if steps == 1 and M >= 1024:
        tm_eff = _round_up(pl.cdiv(M, 2), 8)
        steps = pl.cdiv(M, tm_eff)
    grid = (steps,)

    ordered = [packed[k] for k in
               ("W1", "b1", "gamma", "beta",
                "pw2p", "pb2p", "W2r", "b2r", "wfp", "bfp")]

    # VMEM budget derived from actual buffer sizes (instead of a hard-coded cap),
    # clamped to 64 MiB so it is valid on every chip generation.
    param_bytes = sum(int(p.size) * p.dtype.itemsize for p in ordered)
    param_bufs = 2 if param_buffer_count is None else param_buffer_count
    io_bytes = 2 * tm_eff * D * x.dtype.itemsize + 2 * tm_eff * V * 4
    inter_bytes = tm_eff * (4 * Hp + 2 * Hp + 2 * 128 + 3 * Vp) * 4
    vmem_limit = int(min(64 * 2 ** 20,
                         max(32 * 2 ** 20,
                             2 * (param_bytes * param_bufs + io_bytes + inter_bytes))))

    cost = pl.CostEstimate(
        flops=2 * M * (D * 4 * Hp + Hp * 128 + 3 * Hp * Vp + 3 * Vp * Vp),
        transcendentals=M * (4 * Hp + 128 + 1),          # GELU + exp + reciprocal
        bytes_accessed=M * D * x.dtype.itemsize + M * V * 4 + param_bytes,
    )

    kernel = partial(_vda_kernel, H=H, Hp=Hp, V=V, Vp=Vp, gelu_approx=gelu_approx)

    out = pl.pallas_call(
        kernel,
        out_shape=jax.ShapeDtypeStruct((M, V), jnp.float32),
        grid_spec=pltpu.PrefetchScalarGridSpec(
            num_scalar_prefetch=0,
            grid=grid,
            in_specs=[pl.BlockSpec((tm_eff, D), lambda i: (i, 0))]
                     + [_const_spec(p.shape, param_buffer_count) for p in ordered],
            out_specs=pl.BlockSpec((tm_eff, V), lambda i: (i, 0)),
        ),
        compiler_params=pltpu.CompilerParams(
            dimension_semantics=("parallel",),
            vmem_limit_bytes=vmem_limit,
        ),
        cost_estimate=cost,
    )(x, *ordered)

    return out.reshape(B, S, V)


# --------------------------- parameter creation -------------------------------

def _xavier_uniform(key, fan_in, fan_out):
    bound = math.sqrt(6.0 / (fan_in + fan_out))
    # stored as [in, out] so the kernel computes x @ W (== x @ torch_W.T)
    return jax.random.uniform(key, (fan_in, fan_out), jnp.float32, -bound, bound)


def make_params(key, feature_dim, vocab):
    """Natural (PyTorch-shaped, f32) parameters."""
    D, H, V = feature_dim, feature_dim // 2, vocab
    keys = jax.random.split(key, 16)
    p = {}
    # position encoder
    p["pw1"] = _xavier_uniform(keys[0], D, H)
    p["pb1"] = jnp.zeros((1, H), jnp.float32)
    p["pg"] = jnp.ones((1, H), jnp.float32)
    p["pbe"] = jnp.zeros((1, H), jnp.float32)
    p["pw2"] = _xavier_uniform(keys[1], H, 3)
    p["pb2"] = jnp.zeros((1, 3), jnp.float32)
    # 3 region classifiers (stacked along leading axis)
    p["rw1"] = jnp.stack([_xavier_uniform(keys[2 + i], D, H) for i in range(3)])
    p["rb1"] = jnp.zeros((3, 1, H), jnp.float32)
    p["rg"] = jnp.ones((3, 1, H), jnp.float32)
    p["rbe"] = jnp.zeros((3, 1, H), jnp.float32)
    p["rw2"] = jnp.stack([_xavier_uniform(keys[5 + i], H, V) for i in range(3)])
    p["rb2"] = jnp.zeros((3, 1, V), jnp.float32)
    # output fusion: torch Linear(3V, V); stored [3V, V] then split into 3 [V, V]
    wf = _xavier_uniform(keys[8], 3 * V, V)
    p["wf"] = wf.reshape(3, V, V)
    p["bf"] = jnp.zeros((1, V), jnp.float32)
    return p


def pack_params(p):
    """Kernel-layout parameters: lane-padded, per-branch stacked, bf16 weights."""
    D, H = p["pw1"].shape
    V = p["bf"].shape[-1]
    Hp = _round_up(H, 128)
    Vp = _round_up(V, 128)
    f32, bf16 = jnp.float32, jnp.bfloat16

    w1_list = [p["pw1"], p["rw1"][0], p["rw1"][1], p["rw1"][2]]
    b1_list = [p["pb1"], p["rb1"][0], p["rb1"][1], p["rb1"][2]]
    g_list = [p["pg"], p["rg"][0], p["rg"][1], p["rg"][2]]
    be_list = [p["pbe"], p["rbe"][0], p["rbe"][1], p["rbe"][2]]

    # fused first layer [D, 4*Hp]: each branch's H block lane-padded to Hp with
    # zero weight/bias and zero gamma/beta (padded activations stay exactly 0).
    W1 = jnp.zeros((D, 4 * Hp), f32)
    b1 = jnp.zeros((1, 4 * Hp), f32)
    gamma = jnp.zeros((1, 4 * Hp), f32)
    beta = jnp.zeros((1, 4 * Hp), f32)
    for i in range(4):
        sl = slice(i * Hp, i * Hp + H)
        W1 = W1.at[:, sl].set(w1_list[i])
        b1 = b1.at[:, sl].set(b1_list[i])
        gamma = gamma.at[:, sl].set(g_list[i])
        beta = beta.at[:, sl].set(be_list[i])

    # position second layer padded to [Hp, 128]; pad lanes carry a -1e30 bias so
    # the in-kernel softmax over 128 lanes equals softmax over the real 3.
    pw2p = jnp.zeros((Hp, 128), f32).at[:H, :3].set(p["pw2"])
    pb2p = jnp.full((1, 128), -1e30, f32).at[:, :3].set(p["pb2"])

    # region second layers stacked [3, Hp, Vp] (three separate in-kernel matmuls,
    # no structural-zero block-diagonal); fusion weights stacked [3, Vp, Vp].
    W2r = jnp.zeros((3, Hp, Vp), f32).at[:, :H, :V].set(p["rw2"])
    b2r = jnp.zeros((3, 1, Vp), f32).at[:, :, :V].set(p["rb2"])
    wfp = jnp.zeros((3, Vp, Vp), f32).at[:, :V, :V].set(p["wf"])
    bfp = jnp.zeros((1, Vp), f32).at[:, :V].set(p["bf"])

    return dict(W1=W1.astype(bf16), b1=b1, gamma=gamma, beta=beta,
                pw2p=pw2p.astype(bf16), pb2p=pb2p,
                W2r=W2r.astype(bf16), b2r=b2r,
                wfp=wfp.astype(bf16), bfp=bfp,
                V=V, Vp=Vp, H=H, Hp=Hp, D=D)


# ------------------------------ references ------------------------------------

def reference(features, p, *, bf16_matmuls=False, gelu_approx=False):
    """Pure-JAX forward matching the PyTorch module (bf16_matmuls / gelu_approx
    flags let it mimic the kernel's numerics)."""
    cast = (lambda a: a.astype(jnp.bfloat16)) if bf16_matmuls else (lambda a: a)

    def dense(x, w, b):
        return jnp.dot(cast(x), cast(w), preferred_element_type=jnp.float32) + b

    def block(x, w1, b1, g, be, w2, b2):
        h = dense(x, w1, b1)
        mu = h.mean(-1, keepdims=True)
        var = ((h - mu) ** 2).mean(-1, keepdims=True)
        h = (h - mu) * jax.lax.rsqrt(var + 1e-5) * g + be
        h = _gelu(h, gelu_approx)
        return dense(h, w2, b2)

    pos = block(features, p["pw1"], p["pb1"], p["pg"], p["pbe"], p["pw2"], p["pb2"])
    pos_w = jax.nn.softmax(pos, axis=-1)
    regs = []
    for i in range(3):
        r = block(features, p["rw1"][i], p["rb1"][i], p["rg"][i], p["rbe"][i],
                  p["rw2"][i], p["rb2"][i])
        regs.append(pos_w[..., i:i + 1] * r)
    cat = jnp.concatenate(regs, axis=-1)
    V = p["bf"].shape[-1]
    return dense(cat, p["wf"].reshape(3 * V, V), p["bf"])


# ----------------------------------- main --------------------------------------

if __name__ == "__main__":
    B, S, D, V = 2, 8, 32, 8   # batch, seq, feature_dim, diacritic_vocab_size
    key = jax.random.PRNGKey(0)
    kx, kp = jax.random.split(key)
    features = jax.random.normal(kx, (B, S, D), jnp.float32)

    params = make_params(kp, D, V)
    packed = pack_params(params)

    out = visual_diacritic_attention(features, packed, tm=512, gelu_approx=True)
    out = jax.block_until_ready(out)
    assert out.shape == (B, S, V), out.shape

    # Tight check vs a reference matched to the kernel's numerics
    # (bf16 MXU operands, tanh-approx GELU).
    ref_matched = reference(features, params, bf16_matmuls=True, gelu_approx=True)
    assert jnp.allclose(out, ref_matched, atol=1e-2, rtol=1e-2), \
        "mismatch vs numerics-matched reference"

    # Looser check vs the full-f32, exact-erf (PyTorch-semantics) reference;
    # bf16 matmul operands + tanh GELU land within a few 1e-3.
    ref_f32 = reference(features, params, bf16_matmuls=False, gelu_approx=False)
    assert jnp.allclose(out, ref_f32, atol=5e-2, rtol=5e-2), "mismatch vs f32 reference"

    print("KERNEL_OK")
</pallas_src>

<mosaic_0001>
module attributes {stable_mosaic.version = 11 : i64} {
  func.func @_vda_kernel(%arg0: i32, %arg1: memref<16x32xf32, #tpu.memory_space<vmem>>, %arg2: memref<32x512xbf16, #tpu.memory_space<vmem>>, %arg3: memref<1x512xf32, #tpu.memory_space<vmem>>, %arg4: memref<1x512xf32, #tpu.memory_space<vmem>>, %arg5: memref<1x512xf32, #tpu.memory_space<vmem>>, %arg6: memref<128x128xbf16, #tpu.memory_space<vmem>>, %arg7: memref<1x128xf32, #tpu.memory_space<vmem>>, %arg8: memref<3x128x128xbf16, #tpu.memory_space<vmem>>, %arg9: memref<3x1x128xf32, #tpu.memory_space<vmem>>, %arg10: memref<3x128x128xbf16, #tpu.memory_space<vmem>>, %arg11: memref<1x128xf32, #tpu.memory_space<vmem>>, %arg12: memref<16x8xf32, #tpu.memory_space<vmem>>) attributes {dimension_semantics = [#tpu.dimension_semantics<parallel>], iteration_bounds = array<i64: 1>, scalar_prefetch = 0 : i64, scratch_operands = 0 : i64, tpu.core_type = #tpu.core_type<tc>, window_params = [{transform_indices = @transform_0, window_bounds = array<i64: 16, 32>}, {pipeline_mode = #tpu.pipeline_mode<synchronous>, transform_indices = @transform_1, window_bounds = array<i64: 32, 512>}, {pipeline_mode = #tpu.pipeline_mode<synchronous>, transform_indices = @transform_2, window_bounds = array<i64: 1, 512>}, {pipeline_mode = #tpu.pipeline_mode<synchronous>, transform_indices = @transform_3, window_bounds = array<i64: 1, 512>}, {pipeline_mode = #tpu.pipeline_mode<synchronous>, transform_indices = @transform_4, window_bounds = array<i64: 1, 512>}, {pipeline_mode = #tpu.pipeline_mode<synchronous>, transform_indices = @transform_5, window_bounds = array<i64: 128, 128>}, {pipeline_mode = #tpu.pipeline_mode<synchronous>, transform_indices = @transform_6, window_bounds = array<i64: 1, 128>}, {pipeline_mode = #tpu.pipeline_mode<synchronous>, transform_indices = @transform_7, window_bounds = array<i64: 3, 128, 128>}, {pipeline_mode = #tpu.pipeline_mode<synchronous>, transform_indices = @transform_8, window_bounds = array<i64: 3, 1, 128>}, {pipeline_mode = #tpu.pipeline_mode<synchronous>, transform_indices = @transform_9, window_bounds = array<i64: 3, 128, 128>}, {pipeline_mode = #tpu.pipeline_mode<synchronous>, transform_indices = @transform_10, window_bounds = array<i64: 1, 128>}, {transform_indices = @transform_11, window_bounds = array<i64: 16, 8>}]} {
    %c0 = arith.constant 0 : index
    %c0_0 = arith.constant 0 : index
    %0 = vector.load %arg1[%c0, %c0_0] : memref<16x32xf32, #tpu.memory_space<vmem>>, vector<16x32xf32>
    %1 = arith.truncf %0 : vector<16x32xf32> to vector<16x32xbf16>
    %c0_1 = arith.constant 0 : index
    %c0_2 = arith.constant 0 : index
    %2 = vector.load %arg2[%c0_1, %c0_2] : memref<32x512xbf16, #tpu.memory_space<vmem>>, vector<32x512xbf16>
    %cst = arith.constant dense<0.000000e+00> : vector<16x512xf32>
    %3 = tpu.matmul %1, %2, %cst {dimension_numbers = #tpu.dot_dimension_numbers<[1], [0], [0], [1], [0, 0, 1, 1], [], []>} : vector<16x32xbf16>, vector<32x512xbf16>, vector<16x512xf32> -> vector<16x512xf32>
    %c0_3 = arith.constant 0 : index
    %c0_4 = arith.constant 0 : index
    %4 = vector.load %arg3[%c0_3, %c0_4] : memref<1x512xf32, #tpu.memory_space<vmem>>, vector<1x512xf32>
    %5 = vector.broadcast %4 : vector<1x512xf32> to vector<16x512xf32>
    %6 = arith.addf %3, %5 : vector<16x512xf32>
    %7 = vector.extract_strided_slice %6 {offsets = [0, 0], sizes = [16, 128], strides = [1, 1]} : vector<16x512xf32> to vector<16x128xf32>
    %c0_5 = arith.constant 0 : index
    %c0_6 = arith.constant 0 : index
    %8 = vector.load %arg4[%c0_5, %c0_6] : memref<1x512xf32, #tpu.memory_space<vmem>>, vector<1x128xf32>
    %c0_7 = arith.constant 0 : index
    %c0_8 = arith.constant 0 : index
    %9 = vector.load %arg5[%c0_7, %c0_8] : memref<1x512xf32, #tpu.memory_space<vmem>>, vector<1x128xf32>
    %cst_9 = arith.constant dense<0.000000e+00> : vector<16xf32>
    %10 = vector.multi_reduction <add>, %7, %cst_9 [1] : vector<16x128xf32> to vector<16xf32>
    %11 = vector.shape_cast %10 : vector<16xf32> to vector<16x1xf32>
    %cst_10 = arith.constant 6.250000e-02 : f32
    %12 = vector.broadcast %cst_10 : f32 to vector<16x1xf32>
    %13 = arith.mulf %11, %12 : vector<16x1xf32>
    %14 = arith.mulf %7, %7 : vector<16x128xf32>
    %cst_11 = arith.constant dense<0.000000e+00> : vector<16xf32>
    %15 = vector.multi_reduction <add>, %14, %cst_11 [1] : vector<16x128xf32> to vector<16xf32>
    %16 = vector.shape_cast %15 : vector<16xf32> to vector<16x1xf32>
    %cst_12 = arith.constant 6.250000e-02 : f32
    %17 = vector.broadcast %cst_12 : f32 to vector<16x1xf32>
    %18 = arith.mulf %16, %17 : vector<16x1xf32>
    %19 = arith.mulf %13, %13 : vector<16x1xf32>
    %20 = arith.subf %18, %19 : vector<16x1xf32>
    %cst_13 = arith.constant 0.000000e+00 : f32
    %21 = vector.broadcast %cst_13 : f32 to vector<16x1xf32>
    %22 = arith.maximumf %20, %21 : vector<16x1xf32>
    %23 = vector.broadcast %13 : vector<16x1xf32> to vector<16x128xf32>
    %24 = arith.subf %7, %23 : vector<16x128xf32>
    %cst_14 = arith.constant 9.99999974E-6 : f32
    %25 = vector.broadcast %cst_14 : f32 to vector<16x1xf32>
    %26 = arith.addf %22, %25 : vector<16x1xf32>
    %27 = math.rsqrt %26 : vector<16x1xf32>
    %28 = vector.broadcast %27 : vector<16x1xf32> to vector<16x128xf32>
    %29 = arith.mulf %24, %28 : vector<16x128xf32>
    %30 = vector.broadcast %8 : vector<1x128xf32> to vector<16x128xf32>
    %31 = arith.mulf %29, %30 : vector<16x128xf32>
    %32 = vector.broadcast %9 : vector<1x128xf32> to vector<16x128xf32>
    %33 = arith.addf %31, %32 : vector<16x128xf32>
    %34 = arith.mulf %33, %33 : vector<16x128xf32>
    %35 = arith.mulf %33, %34 : vector<16x128xf32>
    %cst_15 = arith.constant 4.471500e-02 : f32
    %36 = vector.broadcast %cst_15 : f32 to vector<16x128xf32>
    %37 = arith.mulf %36, %35 : vector<16x128xf32>
    %38 = arith.addf %33, %37 : vector<16x128xf32>
    %cst_16 = arith.constant 0.797884583 : f32
    %39 = vector.broadcast %cst_16 : f32 to vector<16x128xf32>
    %40 = arith.mulf %39, %38 : vector<16x128xf32>
    %41 = math.tanh %40 : vector<16x128xf32>
    %cst_17 = arith.constant 1.000000e+00 : f32
    %42 = vector.broadcast %cst_17 : f32 to vector<16x128xf32>
    %43 = arith.addf %42, %41 : vector<16x128xf32>
    %cst_18 = arith.constant 5.000000e-01 : f32
    %44 = vector.broadcast %cst_18 : f32 to vector<16x128xf32>
    %45 = arith.mulf %44, %43 : vector<16x128xf32>
    %46 = arith.mulf %33, %45 : vector<16x128xf32>
    %47 = arith.truncf %46 : vector<16x128xf32> to vector<16x128xbf16>
    %c0_19 = arith.constant 0 : index
    %c0_20 = arith.constant 0 : index
    %48 = vector.load %arg6[%c0_19, %c0_20] : memref<128x128xbf16, #tpu.memory_space<vmem>>, vector<128x128xbf16>
    %cst_21 = arith.constant dense<0.000000e+00> : vector<16x128xf32>
    %49 = tpu.matmul %47, %48, %cst_21 {dimension_numbers = #tpu.dot_dimension_numbers<[1], [0], [0], [1], [0, 0, 1, 1], [], []>} : vector<16x128xbf16>, vector<128x128xbf16>, vector<16x128xf32> -> vector<16x128xf32>
    %c0_22 = arith.constant 0 : index
    %c0_23 = arith.constant 0 : index
    %50 = vector.load %arg7[%c0_22, %c0_23] : memref<1x128xf32, #tpu.memory_space<vmem>>, vector<1x128xf32>
    %51 = vector.broadcast %50 : vector<1x128xf32> to vector<16x128xf32>
    %52 = arith.addf %49, %51 : vector<16x128xf32>
    %cst_24 = arith.constant dense<0xFF800000> : vector<16xf32>
    %53 = vector.multi_reduction <maximumf>, %52, %cst_24 [1] : vector<16x128xf32> to vector<16xf32>
    %54 = vector.shape_cast %53 : vector<16xf32> to vector<16x1xf32>
    %55 = vector.broadcast %54 : vector<16x1xf32> to vector<16x128xf32>
    %56 = arith.subf %52, %55 : vector<16x128xf32>
    %57 = math.exp %56 : vector<16x128xf32>
    %cst_25 = arith.constant dense<0.000000e+00> : vector<16xf32>
    %58 = vector.multi_reduction <add>, %57, %cst_25 [1] : vector<16x128xf32> to vector<16xf32>
    %59 = vector.shape_cast %58 : vector<16xf32> to vector<16x1xf32>
    %60 = tpu.reciprocal %59 {approx = true} : vector<16x1xf32> -> vector<16x1xf32>
    %61 = vector.broadcast %60 : vector<16x1xf32> to vector<16x128xf32>
    %62 = arith.mulf %57, %61 : vector<16x128xf32>
    %cst_26 = arith.constant 0.000000e+00 : f32
    %63 = vector.broadcast %cst_26 : f32 to vector<16x128xf32>
    %64 = vector.extract_strided_slice %6 {offsets = [0, 128], sizes = [16, 128], strides = [1, 1]} : vector<16x512xf32> to vector<16x128xf32>
    %c0_27 = arith.constant 0 : index
    %c128 = arith.constant 128 : index
    %65 = vector.load %arg4[%c0_27, %c128] : memref<1x512xf32, #tpu.memory_space<vmem>>, vector<1x128xf32>
    %c0_28 = arith.constant 0 : index
    %c128_29 = arith.constant 128 : index
    %66 = vector.load %arg5[%c0_28, %c128_29] : memref<1x512xf32, #tpu.memory_space<vmem>>, vector<1x128xf32>
    %cst_30 = arith.constant dense<0.000000e+00> : vector<16xf32>
    %67 = vector.multi_reduction <add>, %64, %cst_30 [1] : vector<16x128xf32> to vector<16xf32>
    %68 = vector.shape_cast %67 : vector<16xf32> to vector<16x1xf32>
    %cst_31 = arith.constant 6.250000e-02 : f32
    %69 = vector.broadcast %cst_31 : f32 to vector<16x1xf32>
    %70 = arith.mulf %68, %69 : vector<16x1xf32>
    %71 = arith.mulf %64, %64 : vector<16x128xf32>
    %cst_32 = arith.constant dense<0.000000e+00> : vector<16xf32>
    %72 = vector.multi_reduction <add>, %71, %cst_32 [1] : vector<16x128xf32> to vector<16xf32>
    %73 = vector.shape_cast %72 : vector<16xf32> to vector<16x1xf32>
    %cst_33 = arith.constant 6.250000e-02 : f32
    %74 = vector.broadcast %cst_33 : f32 to vector<16x1xf32>
    %75 = arith.mulf %73, %74 : vector<16x1xf32>
    %76 = arith.mulf %70, %70 : vector<16x1xf32>
    %77 = arith.subf %75, %76 : vector<16x1xf32>
    %cst_34 = arith.constant 0.000000e+00 : f32
    %78 = vector.broadcast %cst_34 : f32 to vector<16x1xf32>
    %79 = arith.maximumf %77, %78 : vector<16x1xf32>
    %80 = vector.broadcast %70 : vector<16x1xf32> to vector<16x128xf32>
    %81 = arith.subf %64, %80 : vector<16x128xf32>
    %cst_35 = arith.constant 9.99999974E-6 : f32
    %82 = vector.broadcast %cst_35 : f32 to vector<16x1xf32>
    %83 = arith.addf %79, %82 : vector<16x1xf32>
    %84 = math.rsqrt %83 : vector<16x1xf32>
    %85 = vector.broadcast %84 : vector<16x1xf32> to vector<16x128xf32>
    %86 = arith.mulf %81, %85 : vector<16x128xf32>
    %87 = vector.broadcast %65 : vector<1x128xf32> to vector<16x128xf32>
    %88 = arith.mulf %86, %87 : vector<16x128xf32>
    %89 = vector.broadcast %66 : vector<1x128xf32> to vector<16x128xf32>
    %90 = arith.addf %88, %89 : vector<16x128xf32>
    %91 = arith.mulf %90, %90 : vector<16x128xf32>
    %92 = arith.mulf %90, %91 : vector<16x128xf32>
    %cst_36 = arith.constant 4.471500e-02 : f32
    %93 = vector.broadcast %cst_36 : f32 to vector<16x128xf32>
    %94 = arith.mulf %93, %92 : vector<16x128xf32>
    %95 = arith.addf %90, %94 : vector<16x128xf32>
    %cst_37 = arith.constant 0.797884583 : f32
    %96 = vector.broadcast %cst_37 : f32 to vector<16x128xf32>
    %97 = arith.mulf %96, %95 : vector<16x128xf32>
    %98 = math.tanh %97 : vector<16x128xf32>
    %cst_38 = arith.constant 1.000000e+00 : f32
    %99 = vector.broadcast %cst_38 : f32 to vector<16x128xf32>
    %100 = arith.addf %99, %98 : vector<16x128xf32>
    %cst_39 = arith.constant 5.000000e-01 : f32
    %101 = vector.broadcast %cst_39 : f32 to vector<16x128xf32>
    %102 = arith.mulf %101, %100 : vector<16x128xf32>
    %103 = arith.mulf %90, %102 : vector<16x128xf32>
    %104 = arith.truncf %103 : vector<16x128xf32> to vector<16x128xbf16>
    %c0_40 = arith.constant 0 : index
    %c0_41 = arith.constant 0 : index
    %c0_42 = arith.constant 0 : index
    %105 = vector.load %arg8[%c0_40, %c0_41, %c0_42] : memref<3x128x128xbf16, #tpu.memory_space<vmem>>, vector<1x128x128xbf16>
    %106 = vector.shape_cast %105 : vector<1x128x128xbf16> to vector<128x128xbf16>
    %cst_43 = arith.constant dense<0.000000e+00> : vector<16x128xf32>
    %107 = tpu.matmul %104, %106, %cst_43 {dimension_numbers = #tpu.dot_dimension_numbers<[1], [0], [0], [1], [0, 0, 1, 1], [], []>} : vector<16x128xbf16>, vector<128x128xbf16>, vector<16x128xf32> -> vector<16x128xf32>
    %c0_44 = arith.constant 0 : index
    %c0_45 = arith.constant 0 : index
    %c0_46 = arith.constant 0 : index
    %108 = vector.load %arg9[%c0_44, %c0_45, %c0_46] : memref<3x1x128xf32, #tpu.memory_space<vmem>>, vector<1x1x128xf32>
    %109 = vector.shape_cast %108 : vector<1x1x128xf32> to vector<1x128xf32>
    %110 = vector.broadcast %109 : vector<1x128xf32> to vector<16x128xf32>
    %111 = arith.addf %107, %110 : vector<16x128xf32>
    %112 = vector.extract_strided_slice %62 {offsets = [0, 0], sizes = [16, 1], strides = [1, 1]} : vector<16x128xf32> to vector<16x1xf32>
    %113 = vector.broadcast %112 : vector<16x1xf32> to vector<16x128xf32>
    %114 = arith.mulf %113, %111 : vector<16x128xf32>
    %115 = arith.truncf %114 : vector<16x128xf32> to vector<16x128xbf16>
    %c0_47 = arith.constant 0 : index
    %c0_48 = arith.constant 0 : index
    %c0_49 = arith.constant 0 : index
    %116 = vector.load %arg10[%c0_47, %c0_48, %c0_49] : memref<3x128x128xbf16, #tpu.memory_space<vmem>>, vector<1x128x128xbf16>
    %117 = vector.shape_cast %116 : vector<1x128x128xbf16> to vector<128x128xbf16>
    %cst_50 = arith.constant dense<0.000000e+00> : vector<16x128xf32>
    %118 = tpu.matmul %115, %117, %cst_50 {dimension_numbers = #tpu.dot_dimension_numbers<[1], [0], [0], [1], [0, 0, 1, 1], [], []>} : vector<16x128xbf16>, vector<128x128xbf16>, vector<16x128xf32> -> vector<16x128xf32>
    %119 = arith.addf %63, %118 : vector<16x128xf32>
    %120 = vector.extract_strided_slice %6 {offsets = [0, 256], sizes = [16, 128], strides = [1, 1]} : vector<16x512xf32> to vector<16x128xf32>
    %c0_51 = arith.constant 0 : index
    %c256 = arith.constant 256 : index
    %121 = vector.load %arg4[%c0_51, %c256] : memref<1x512xf32, #tpu.memory_space<vmem>>, vector<1x128xf32>
    %c0_52 = arith.constant 0 : index
    %c256_53 = arith.constant 256 : index
    %122 = vector.load %arg5[%c0_52, %c256_53] : memref<1x512xf32, #tpu.memory_space<vmem>>, vector<1x128xf32>
    %cst_54 = arith.constant dense<0.000000e+00> : vector<16xf32>
    %123 = vector.multi_reduction <add>, %120, %cst_54 [1] : vector<16x128xf32> to vector<16xf32>
    %124 = vector.shape_cast %123 : vector<16xf32> to vector<16x1xf32>
    %cst_55 = arith.constant 6.250000e-02 : f32
    %125 = vector.broadcast %cst_55 : f32 to vector<16x1xf32>
    %126 = arith.mulf %124, %125 : vector<16x1xf32>
    %127 = arith.mulf %120, %120 : vector<16x128xf32>
    %cst_56 = arith.constant dense<0.000000e+00> : vector<16xf32>
    %128 = vector.multi_reduction <add>, %127, %cst_56 [1] : vector<16x128xf32> to vector<16xf32>
    %129 = vector.shape_cast %128 : vector<16xf32> to vector<16x1xf32>
    %cst_57 = arith.constant 6.250000e-02 : f32
    %130 = vector.broadcast %cst_57 : f32 to vector<16x1xf32>
    %131 = arith.mulf %129, %130 : vector<16x1xf32>
    %132 = arith.mulf %126, %126 : vector<16x1xf32>
    %133 = arith.subf %131, %132 : vector<16x1xf32>
    %cst_58 = arith.constant 0.000000e+00 : f32
    %134 = vector.broadcast %cst_58 : f32 to vector<16x1xf32>
    %135 = arith.maximumf %133, %134 : vector<16x1xf32>
    %136 = vector.broadcast %126 : vector<16x1xf32> to vector<16x128xf32>
    %137 = arith.subf %120, %136 : vector<16x128xf32>
    %cst_59 = arith.constant 9.99999974E-6 : f32
    %138 = vector.broadcast %cst_59 : f32 to vector<16x1xf32>
    %139 = arith.addf %135, %138 : vector<16x1xf32>
    %140 = math.rsqrt %139 : vector<16x1xf32>
    %141 = vector.broadcast %140 : vector<16x1xf32> to vector<16x128xf32>
    %142 = arith.mulf %137, %141 : vector<16x128xf32>
    %143 = vector.broadcast %121 : vector<1x128xf32> to vector<16x128xf32>
    %144 = arith.mulf %142, %143 : vector<16x128xf32>
    %145 = vector.broadcast %122 : vector<1x128xf32> to vector<16x128xf32>
    %146 = arith.addf %144, %145 : vector<16x128xf32>
    %147 = arith.mulf %146, %146 : vector<16x128xf32>
    %148 = arith.mulf %146, %147 : vector<16x128xf32>
    %cst_60 = arith.constant 4.471500e-02 : f32
    %149 = vector.broadcast %cst_60 : f32 to vector<16x128xf32>
    %150 = arith.mulf %149, %148 : vector<16x128xf32>
    %151 = arith.addf %146, %150 : vector<16x128xf32>
    %cst_61 = arith.constant 0.797884583 : f32
    %152 = vector.broadcast %cst_61 : f32 to vector<16x128xf32>
    %153 = arith.mulf %152, %151 : vector<16x128xf32>
    %154 = math.tanh %153 : vector<16x128xf32>
    %cst_62 = arith.constant 1.000000e+00 : f32
    %155 = vector.broadcast %cst_62 : f32 to vector<16x128xf32>
    %156 = arith.addf %155, %154 : vector<16x128xf32>
    %cst_63 = arith.constant 5.000000e-01 : f32
    %157 = vector.broadcast %cst_63 : f32 to vector<16x128xf32>
    %158 = arith.mulf %157, %156 : vector<16x128xf32>
    %159 = arith.mulf %146, %158 : vector<16x128xf32>
    %160 = arith.truncf %159 : vector<16x128xf32> to vector<16x128xbf16>
    %c1 = arith.constant 1 : index
    %c0_64 = arith.constant 0 : index
    %c0_65 = arith.constant 0 : index
    %161 = vector.load %arg8[%c1, %c0_64, %c0_65] : memref<3x128x128xbf16, #tpu.memory_space<vmem>>, vector<1x128x128xbf16>
    %162 = vector.shape_cast %161 : vector<1x128x128xbf16> to vector<128x128xbf16>
    %cst_66 = arith.constant dense<0.000000e+00> : vector<16x128xf32>
    %163 = tpu.matmul %160, %162, %cst_66 {dimension_numbers = #tpu.dot_dimension_numbers<[1], [0], [0], [1], [0, 0, 1, 1], [], []>} : vector<16x128xbf16>, vector<128x128xbf16>, vector<16x128xf32> -> vector<16x128xf32>
    %c1_67 = arith.constant 1 : index
    %c0_68 = arith.constant 0 : index
    %c0_69 = arith.constant 0 : index
    %164 = vector.load %arg9[%c1_67, %c0_68, %c0_69] : memref<3x1x128xf32, #tpu.memory_space<vmem>>, vector<1x1x128xf32>
    %165 = vector.shape_cast %164 : vector<1x1x128xf32> to vector<1x128xf32>
    %166 = vector.broadcast %165 : vector<1x128xf32> to vector<16x128xf32>
    %167 = arith.addf %163, %166 : vector<16x128xf32>
    %168 = vector.extract_strided_slice %62 {offsets = [0, 1], sizes = [16, 1], strides = [1, 1]} : vector<16x128xf32> to vector<16x1xf32>
    %169 = vector.broadcast %168 : vector<16x1xf32> to vector<16x128xf32>
    %170 = arith.mulf %169, %167 : vector<16x128xf32>
    %171 = arith.truncf %170 : vector<16x128xf32> to vector<16x128xbf16>
    %c1_70 = arith.constant 1 : index
    %c0_71 = arith.constant 0 : index
    %c0_72 = arith.constant 0 : index
    %172 = vector.load %arg10[%c1_70, %c0_71, %c0_72] : memref<3x128x128xbf16, #tpu.memory_space<vmem>>, vector<1x128x128xbf16>
    %173 = vector.shape_cast %172 : vector<1x128x128xbf16> to vector<128x128xbf16>
    %cst_73 = arith.constant dense<0.000000e+00> : vector<16x128xf32>
    %174 = tpu.matmul %171, %173, %cst_73 {dimension_numbers = #tpu.dot_dimension_numbers<[1], [0], [0], [1], [0, 0, 1, 1], [], []>} : vector<16x128xbf16>, vector<128x128xbf16>, vector<16x128xf32> -> vector<16x128xf32>
    %175 = arith.addf %119, %174 : vector<16x128xf32>
    %176 = vector.extract_strided_slice %6 {offsets = [0, 384], sizes = [16, 128], strides = [1, 1]} : vector<16x512xf32> to vector<16x128xf32>
    %c0_74 = arith.constant 0 : index
    %c384 = arith.constant 384 : index
    %177 = vector.load %arg4[%c0_74, %c384] : memref<1x512xf32, #tpu.memory_space<vmem>>, vector<1x128xf32>
    %c0_75 = arith.constant 0 : index
    %c384_76 = arith.constant 384 : index
    %178 = vector.load %arg5[%c0_75, %c384_76] : memref<1x512xf32, #tpu.memory_space<vmem>>, vector<1x128xf32>
    %cst_77 = arith.constant dense<0.000000e+00> : vector<16xf32>
    %179 = vector.multi_reduction <add>, %176, %cst_77 [1] : vector<16x128xf32> to vector<16xf32>
    %180 = vector.shape_cast %179 : vector<16xf32> to vector<16x1xf32>
    %cst_78 = arith.constant 6.250000e-02 : f32
    %181 = vector.broadcast %cst_78 : f32 to vector<16x1xf32>
    %182 = arith.mulf %180, %181 : vector<16x1xf32>
    %183 = arith.mulf %176, %176 : vector<16x128xf32>
    %cst_79 = arith.constant dense<0.000000e+00> : vector<16xf32>
    %184 = vector.multi_reduction <add>, %183, %cst_79 [1] : vector<16x128xf32> to vector<16xf32>
    %185 = vector.shape_cast %184 : vector<16xf32> to vector<16x1xf32>
    %cst_80 = arith.constant 6.250000e-02 : f32
    %186 = vector.broadcast %cst_80 : f32 to vector<16x1xf32>
    %187 = arith.mulf %185, %186 : vector<16x1xf32>
    %188 = arith.mulf %182, %182 : vector<16x1xf32>
    %189 = arith.subf %187, %188 : vector<16x1xf32>
    %cst_81 = arith.constant 0.000000e+00 : f32
    %190 = vector.broadcast %cst_81 : f32 to vector<16x1xf32>
    %191 = arith.maximumf %189, %190 : vector<16x1xf32>
    %192 = vector.broadcast %182 : vector<16x1xf32> to vector<16x128xf32>
    %193 = arith.subf %176, %192 : vector<16x128xf32>
    %cst_82 = arith.constant 9.99999974E-6 : f32
    %194 = vector.broadcast %cst_82 : f32 to vector<16x1xf32>
    %195 = arith.addf %191, %194 : vector<16x1xf32>
    %196 = math.rsqrt %195 : vector<16x1xf32>
    %197 = vector.broadcast %196 : vector<16x1xf32> to vector<16x128xf32>
    %198 = arith.mulf %193, %197 : vector<16x128xf32>
    %199 = vector.broadcast %177 : vector<1x128xf32> to vector<16x128xf32>
    %200 = arith.mulf %198, %199 : vector<16x128xf32>
    %201 = vector.broadcast %178 : vector<1x128xf32> to vector<16x128xf32>
    %202 = arith.addf %200, %201 : vector<16x128xf32>
    %203 = arith.mulf %202, %202 : vector<16x128xf32>
    %204 = arith.mulf %202, %203 : vector<16x128xf32>
    %cst_83 = arith.constant 4.471500e-02 : f32
    %205 = vector.broadcast %cst_83 : f32 to vector<16x128xf32>
    %206 = arith.mulf %205, %204 : vector<16x128xf32>
    %207 = arith.addf %202, %206 : vector<16x128xf32>
    %cst_84 = arith.constant 0.797884583 : f32
    %208 = vector.broadcast %cst_84 : f32 to vector<16x128xf32>
    %209 = arith.mulf %208, %207 : vector<16x128xf32>
    %210 = math.tanh %209 : vector<16x128xf32>
    %cst_85 = arith.constant 1.000000e+00 : f32
    %211 = vector.broadcast %cst_85 : f32 to vector<16x128xf32>
    %212 = arith.addf %211, %210 : vector<16x128xf32>
    %cst_86 = arith.constant 5.000000e-01 : f32
    %213 = vector.broadcast %cst_86 : f32 to vector<16x128xf32>
    %214 = arith.mulf %213, %212 : vector<16x128xf32>
    %215 = arith.mulf %202, %214 : vector<16x128xf32>
    %216 = arith.truncf %215 : vector<16x128xf32> to vector<16x128xbf16>
    %c2 = arith.constant 2 : index
    %c0_87 = arith.constant 0 : index
    %c0_88 = arith.constant 0 : index
    %217 = vector.load %arg8[%c2, %c0_87, %c0_88] : memref<3x128x128xbf16, #tpu.memory_space<vmem>>, vector<1x128x128xbf16>
    %218 = vector.shape_cast %217 : vector<1x128x128xbf16> to vector<128x128xbf16>
    %cst_89 = arith.constant dense<0.000000e+00> : vector<16x128xf32>
    %219 = tpu.matmul %216, %218, %cst_89 {dimension_numbers = #tpu.dot_dimension_numbers<[1], [0], [0], [1], [0, 0, 1, 1], [], []>} : vector<16x128xbf16>, vector<128x128xbf16>, vector<16x128xf32> -> vector<16x128xf32>
    %c2_90 = arith.constant 2 : index
    %c0_91 = arith.constant 0 : index
    %c0_92 = arith.constant 0 : index
    %220 = vector.load %arg9[%c2_90, %c0_91, %c0_92] : memref<3x1x128xf32, #tpu.memory_space<vmem>>, vector<1x1x128xf32>
    %221 = vector.shape_cast %220 : vector<1x1x128xf32> to vector<1x128xf32>
    %222 = vector.broadcast %221 : vector<1x128xf32> to vector<16x128xf32>
    %223 = arith.addf %219, %222 : vector<16x128xf32>
    %224 = vector.extract_strided_slice %62 {offsets = [0, 2], sizes = [16, 1], strides = [1, 1]} : vector<16x128xf32> to vector<16x1xf32>
    %225 = vector.broadcast %224 : vector<16x1xf32> to vector<16x128xf32>
    %226 = arith.mulf %225, %223 : vector<16x128xf32>
    %227 = arith.truncf %226 : vector<16x128xf32> to vector<16x128xbf16>
    %c2_93 = arith.constant 2 : index
    %c0_94 = arith.constant 0 : index
    %c0_95 = arith.constant 0 : index
    %228 = vector.load %arg10[%c2_93, %c0_94, %c0_95] : memref<3x128x128xbf16, #tpu.memory_space<vmem>>, vector<1x128x128xbf16>
    %229 = vector.shape_cast %228 : vector<1x128x128xbf16> to vector<128x128xbf16>
    %cst_96 = arith.constant dense<0.000000e+00> : vector<16x128xf32>
    %230 = tpu.matmul %227, %229, %cst_96 {dimension_numbers = #tpu.dot_dimension_numbers<[1], [0], [0], [1], [0, 0, 1, 1], [], []>} : vector<16x128xbf16>, vector<128x128xbf16>, vector<16x128xf32> -> vector<16x128xf32>
    %231 = arith.addf %175, %230 : vector<16x128xf32>
    %c0_97 = arith.constant 0 : index
    %c0_98 = arith.constant 0 : index
    %232 = vector.load %arg11[%c0_97, %c0_98] : memref<1x128xf32, #tpu.memory_space<vmem>>, vector<1x128xf32>
    %233 = vector.broadcast %232 : vector<1x128xf32> to vector<16x128xf32>
    %234 = arith.addf %231, %233 : vector<16x128xf32>
    %235 = vector.extract_strided_slice %234 {offsets = [0, 0], sizes = [16, 8], strides = [1, 1]} : vector<16x128xf32> to vector<16x8xf32>
    %c0_99 = arith.constant 0 : index
    %c0_100 = arith.constant 0 : index
    %236 = vector.load %arg12[%c0_99, %c0_100] : memref<16x8xf32, #tpu.memory_space<vmem>>, vector<16x8xf32>
    tpu.vector_store %arg12[%c0_99, %c0_100], %235 {strides = array<i32>} : memref<16x8xf32, #tpu.memory_space<vmem>>, vector<16x8xf32>,
    return
  }
  func.func @transform_0(%arg0: i32) -> (i32, i32) {
    %c0_i32 = arith.constant 0 : i32
    %c0_i32_0 = arith.constant 0 : i32
    return %arg0, %c0_i32 : i32, i32
  }
  func.func @transform_1(%arg0: i32) -> (i32, i32) {
    %c0_i32 = arith.constant 0 : i32
    %c0_i32_0 = arith.constant 0 : i32
    %c0_i32_1 = arith.constant 0 : i32
    return %c0_i32, %c0_i32_0 : i32, i32
  }
  func.func @transform_2(%arg0: i32) -> (i32, i32) {
    %c0_i32 = arith.constant 0 : i32
    %c0_i32_0 = arith.constant 0 : i32
    %c0_i32_1 = arith.constant 0 : i32
    return %c0_i32, %c0_i32_0 : i32, i32
  }
  func.func @transform_3(%arg0: i32) -> (i32, i32) {
    %c0_i32 = arith.constant 0 : i32
    %c0_i32_0 = arith.constant 0 : i32
    %c0_i32_1 = arith.constant 0 : i32
    return %c0_i32, %c0_i32_0 : i32, i32
  }
  func.func @transform_4(%arg0: i32) -> (i32, i32) {
    %c0_i32 = arith.constant 0 : i32
    %c0_i32_0 = arith.constant 0 : i32
    %c0_i32_1 = arith.constant 0 : i32
    return %c0_i32, %c0_i32_0 : i32, i32
  }
  func.func @transform_5(%arg0: i32) -> (i32, i32) {
    %c0_i32 = arith.constant 0 : i32
    %c0_i32_0 = arith.constant 0 : i32
    %c0_i32_1 = arith.constant 0 : i32
    return %c0_i32, %c0_i32_0 : i32, i32
  }
  func.func @transform_6(%arg0: i32) -> (i32, i32) {
    %c0_i32 = arith.constant 0 : i32
    %c0_i32_0 = arith.constant 0 : i32
    %c0_i32_1 = arith.constant 0 : i32
    return %c0_i32, %c0_i32_0 : i32, i32
  }
  func.func @transform_7(%arg0: i32) -> (i32, i32, i32) {
    %c0_i32 = arith.constant 0 : i32
    %c0_i32_0 = arith.constant 0 : i32
    %c0_i32_1 = arith.constant 0 : i32
    %c0_i32_2 = arith.constant 0 : i32
    return %c0_i32, %c0_i32_0, %c0_i32_1 : i32, i32, i32
  }
  func.func @transform_8(%arg0: i32) -> (i32, i32, i32) {
    %c0_i32 = arith.constant 0 : i32
    %c0_i32_0 = arith.constant 0 : i32
    %c0_i32_1 = arith.constant 0 : i32
    %c0_i32_2 = arith.constant 0 : i32
    return %c0_i32, %c0_i32_0, %c0_i32_1 : i32, i32, i32
  }
  func.func @transform_9(%arg0: i32) -> (i32, i32, i32) {
    %c0_i32 = arith.constant 0 : i32
    %c0_i32_0 = arith.constant 0 : i32
    %c0_i32_1 = arith.constant 0 : i32
    %c0_i32_2 = arith.constant 0 : i32
    return %c0_i32, %c0_i32_0, %c0_i32_1 : i32, i32, i32
  }
  func.func @transform_10(%arg0: i32) -> (i32, i32) {
    %c0_i32 = arith.constant 0 : i32
    %c0_i32_0 = arith.constant 0 : i32
    %c0_i32_1 = arith.constant 0 : i32
    return %c0_i32, %c0_i32_0 : i32, i32
  }
  func.func @transform_11(%arg0: i32) -> (i32, i32) {
    %c0_i32 = arith.constant 0 : i32
    %c0_i32_0 = arith.constant 0 : i32
    return %arg0, %c0_i32 : i32, i32
  }
}

</mosaic_0001>

<bundles_post_ra>
// kernel: tpu_custom_call.1
= control target key start
LH: loop header
LB: loop body
LE: loop exit
PB: predicated region body
PF: predicated region fallthrough
CT: control target
= control target key end

     0   :  { %16 = vsyncpa [#allocation3], 0  ;;  %s2254_s0 = inlined_call_operand.hbm [shape: f32[16,32], index: 0, kind: input, shape index: {}]   ;;  %s2255_s1 = inlined_call_operand.hbm [shape: bf16[32,512], index: 1, kind: input, shape index: {}]   ;;  %s2256_s2 = inlined_call_operand.vmem [shape: f32[1,512], index: 2, kind: input, shape index: {}]   ;;  %s2257_s3 = inlined_call_operand.vmem [shape: f32[1,512], index: 3, kind: input, shape index: {}]   ;;  %s2258_s4 = inlined_call_operand.vmem [shape: f32[1,512], index: 4, kind: input, shape index: {}]   ;;  %s2259_s5 = inlined_call_operand.hbm [shape: bf16[128,128], index: 5, kind: input, shape index: {}]   ;;  %s2260_s6 = inlined_call_operand.vmem [shape: f32[1,128], index: 6, kind: input, shape index: {}]   ;;  %s2261_s7 = inlined_call_operand.hbm [shape: bf16[3,128,128], index: 7, kind: input, shape index: {}]   ;;  %s2262_s8 = inlined_call_operand.vmem [shape: f32[3,1,128], index: 8, kind: input, shape index: {}]   ;;  %s2263_s9 = inlined_call_operand.hbm [shape: bf16[3,128,128], index: 9, kind: input, shape index: {}]   ;;  %s2264_s10 = inlined_call_operand.vmem [shape: f32[1,128], index: 10, kind: input, shape index: {}]   ;;  %s2265_s11 = inlined_call_operand.vmem [shape: f32[16,8], index: 11, kind: output, shape index: {}]  }
   0x1   :  { %17 = vsyncpa [#allocation5], 0 }
   0x2   :  { %18 = vsyncpa [#allocation8], 0  ;;  %s1902_s17 = smov [#allocation4]   ;;  %s1786_s21 = scalar_lea.hbm %s2255_s1, 1024 }
   0x3   :  { %s36_s18 = sshll.u32 %s1902_s17, 4  ;;  %p1787_p0 = scmp.ne.s32.totalorder %s2255_s1, %s1786_s21  ;;  %s37_s18 = int_to_ptr.vmem [resolvable:$true] %s36_s18 }
   0x4   :  { %p1790_p1 = scmp.lt.u32.totalorder %s1786_s21, %s2255_s1 }
   0x6   :  { %p1792_p2 = pnand %p1790_p1, %p1787_p0 }
   0x8   :  { %1795 = shalt.err (!%p1792_p2)
}
   0x9   :  { %s1796_s26 = scalar_lea.vmem %s37_s18, 1024  ;;  %p1801_p4 = scmp.lt.s32.totalorder %s37_s18, %s37_s18 }
   0xa   :  { %p1797_p3 = scmp.ne.s32.totalorder %s37_s18, %s1796_s26  ;;  %p1802_p5 = scmp.lt.s32.totalorder %s1796_s26, %s1796_s26 }
   0xc   :  { %p1803_p6 = por %p1802_p5, %p1801_p4 }
   0xe   :  { %p1804_p7 = pnand %p1803_p6, %p1797_p3 }
  0x10   :  { %1807 = shalt.err (!%p1804_p7)
}
  0x11   :  { %s1903_s27 = smov 256   ;;  %s1904_s28 = smov 16  }
  0x12   :  { %42 = dma.hbm_to_vmem [thread:$0]  %s2255_s1, 1024, %s37_s18, [#allocation5], %s1903_s27, %s1903_s27, %s1904_s28  }
  0x13   :  { %s1905_s12 = smov [#allocation7]   ;;  %s1906_s14 = smov [#allocation2]  }
  0x14   :  { %s68_s13 = sshll.u32 %s1905_s12, 4  ;;  %s24_s15 = sshll.u32 %s1906_s14, 4  ;;  %s69_s13 = int_to_ptr.vmem [resolvable:$true] %s68_s13  ;;  %s25_s15 = int_to_ptr.vmem [resolvable:$true] %s24_s15 }
  0x15   :  { %s1808_s19 = scalar_lea.hbm %s2261_s7, 3072 }
  0x16   :  { %p1809_p8 = scmp.ne.s32.totalorder %s2261_s7, %s1808_s19  ;;  %p1812_p9 = scmp.lt.u32.totalorder %s1808_s19, %s2261_s7 }
  0x18   :  { %p1814_p10 = pnand %p1812_p9, %p1809_p8 }
  0x1a   :  { %1817 = shalt.err (!%p1814_p10)
}
  0x1b   :  { %s1818_s1 = scalar_lea.vmem %s69_s13, 3072  ;;  %p1823_p12 = scmp.lt.s32.totalorder %s69_s13, %s69_s13 }
  0x1c   :  { %p1819_p11 = scmp.ne.s32.totalorder %s69_s13, %s1818_s1  ;;  %p1824_p13 = scmp.lt.s32.totalorder %s1818_s1, %s1818_s1 }
  0x1e   :  { %p1825_p0 = por %p1824_p13, %p1823_p12 }
  0x20   :  { %p1826_p1 = pnand %p1825_p0, %p1819_p11 }
  0x22   :  { %1829 = shalt.err (!%p1826_p1)
}
  0x23   :  { %s1907_s18 = smov 64   ;;  %s1908_s24 = smov 4  }
  0x24   :  { %74 = dma.hbm_to_vmem [thread:$0]  %s2261_s7, 3072, %s69_s13, [#allocation8], %s1907_s18, %s1907_s18, %s1908_s24  }
  0x25   :  { %s1830_s29 = scalar_lea.hbm %s2254_s0, 256 }
  0x26   :  { %p1831_p2 = scmp.ne.s32.totalorder %s2254_s0, %s1830_s29  ;;  %p1834_p3 = scmp.lt.u32.totalorder %s1830_s29, %s2254_s0 }
  0x28   :  { %p1836_p4 = pnand %p1834_p3, %p1831_p2 }
  0x2a   :  { %1839 = shalt.err (!%p1836_p4)
}
  0x2b   :  { %s1840_s17 = scalar_lea.vmem %s25_s15, 256  ;;  %p1845_p6 = scmp.lt.s32.totalorder %s25_s15, %s25_s15 }
  0x2c   :  { %p1841_p5 = scmp.ne.s32.totalorder %s25_s15, %s1840_s17  ;;  %p1846_p7 = scmp.lt.s32.totalorder %s1840_s17, %s1840_s17 }
  0x2e   :  { %p1847_p8 = por %p1846_p7, %p1845_p6 }
  0x30   :  { %p1848_p9 = pnand %p1847_p8, %p1841_p5 }
  0x32   :  { %1851 = shalt.err (!%p1848_p9)
}
  0x33   :  { %s1909_s7 = smov 128   ;;  %s1910_s13 = smov 8  }
  0x34   :  { %30 = dma.hbm_to_vmem [thread:$0]  %s2254_s0, 256, %s25_s15, [#allocation3], %s1909_s7, %s1909_s7, %s1910_s13  }
  0x35   :  { %s1911_s21 = smov [#allocation6]   ;;  %s1912_s23 = smov [#allocation9]  }
  0x36   :  { %s54_s22 = sshll.u32 %s1911_s21, 4  ;;  %s82_s1 = sshll.u32 %s1912_s23, 4  ;;  %s55_s22 = int_to_ptr.vmem [resolvable:$true] %s54_s22  ;;  %s83_s1 = int_to_ptr.vmem [resolvable:$true] %s82_s1 }
  0x37   :  { %s1852_s27 = scalar_lea.hbm %s2259_s5, 1024 }
  0x38   :  { %p1853_p10 = scmp.ne.s32.totalorder %s2259_s5, %s1852_s27  ;;  %p1856_p11 = scmp.lt.u32.totalorder %s1852_s27, %s2259_s5 }
  0x3a   :  { %p1858_p12 = pnand %p1856_p11, %p1853_p10 }
  0x3c   :  { %1861 = shalt.err (!%p1858_p12)
}
  0x3d   :  { %s1862_s0 = scalar_lea.vmem %s55_s22, 1024  ;;  %p1867_p0 = scmp.lt.s32.totalorder %s55_s22, %s55_s22 }
  0x3e   :  { %p1863_p13 = scmp.ne.s32.totalorder %s55_s22, %s1862_s0  ;;  %p1868_p1 = scmp.lt.s32.totalorder %s1862_s0, %s1862_s0 }
  0x40   :  { %p1869_p2 = por %p1868_p1, %p1867_p0 }
  0x42   :  { %p1870_p3 = pnand %p1869_p2, %p1863_p13 }
  0x44   :  { %1873 = shalt.err (!%p1870_p3)
}
  0x45   :  { %60 = dma.hbm_to_vmem [thread:$0]  %s2259_s5, 1024, %s55_s22, [#allocation5], %s1907_s18, %s1907_s18, %s1908_s24  }
  0x46   :  { %s1874_s7 = scalar_lea.hbm %s2263_s9, 3072 }
  0x47   :  { %p1875_p4 = scmp.ne.s32.totalorder %s2263_s9, %s1874_s7  ;;  %p1878_p5 = scmp.lt.u32.totalorder %s1874_s7, %s2263_s9 }
  0x49   :  { %p1880_p6 = pnand %p1878_p5, %p1875_p4 }
  0x4b   :  { %1883 = shalt.err (!%p1880_p6)
}
  0x4c   :  { %s1884_s23 = scalar_lea.vmem %s83_s1, 3072  ;;  %p1889_p8 = scmp.lt.s32.totalorder %s83_s1, %s83_s1 }
  0x4d   :  { %p1885_p7 = scmp.ne.s32.totalorder %s83_s1, %s1884_s23  ;;  %p1890_p9 = scmp.lt.s32.totalorder %s1884_s23, %s1884_s23 }
  0x4f   :  { %p1891_p10 = por %p1890_p9, %p1889_p8 }
  0x51   :  { %p1892_p11 = pnand %p1891_p10, %p1885_p7 }
  0x53   :  { %1895 = shalt.err (!%p1892_p11)
}
  0x54   :  { %88 = dma.hbm_to_vmem [thread:$0]  %s2263_s9, 3072, %s83_s1, [#allocation8], %s1907_s18, %s1907_s18, %s1908_s24  }
  0x55   :  { %1896 = dma.done.wait [#allocation3], 256  }
  0x56   :  { %1897 = vsyncadd [#allocation3], 4294967040 }
  0x57   :  { %1898 = dma.done.wait [#allocation5], 2048  }
  0x58   :  { %1899 = vsyncadd [#allocation5], 4294965248 }
  0x59   :  { %1900 = dma.done.wait [#allocation8], 6144  }
  0x5a   :  { %1901 = vsyncadd [#allocation8], 4294961152  ;;  %v1913_v0 = vmov 0   ;;  %v1678_v1 = vld [vmem:[#allocation4 + $0x4] ss:$16 sps:$4 sm:$0xff]   ;;  %v108_v6 = vld [vmem:[#allocation2 + $0x8] sm:$0xff]  ;;  %v120_v12 = vlaneseq }
  0x5b   :  { %216 = vmatprep.mubr.bf16.mxu1 %v1913_v0  ;;  %v1680_v2 = vld [vmem:[#allocation4] ss:$16 sps:$4 sm:$0xff]   ;;  %184 = vmatprep.subr.bf16.mxu1 %v1678_v1  ;;  %v1681_v3 = vld [vmem:[#allocation4 + $0x24] ss:$16 sps:$4 sm:$0xff]   ;;  %v1686_v7 = vld [vmem:[#allocation4 + $0xc] ss:$16 sps:$4 sm:$0xff]  }
  0x5c   :  { %v1683_v4 = vld [vmem:[#allocation4 + $0x20] ss:$16 sps:$4 sm:$0xff]   ;;  %185 = vmatpush1.bf16.msra.mxu1 %v1680_v2  ;;  %vm180_vm0 = vcmask 261120   ;;  %v1684_v8 = vld [vmem:[#allocation4 + $0x8] ss:$16 sps:$4 sm:$0xff]   ;;  %v2049_v13 = vshrl.u32 %v120_v12, 7 }
  0x5d   :  { %v107_v5 = vld [vmem:[#allocation2] sm:$0xff]  ;;  %186 = vmatprep.subr.bf16.mxu1 %v1681_v3  ;;  %v1689_v10 = vld [vmem:[#allocation4 + $0x2c] ss:$16 sps:$4 sm:$0xff]   ;;  %v1687_v11 = vld [vmem:[#allocation4 + $0x28] ss:$16 sps:$4 sm:$0xff]   ;;  %v1914_v26 = vmov 0.0  }
  0x5e   :  { %v109_v9 = vpack.c.bf16 %v108_v6, %v107_v5  ;;  %v122_v14 = vsub.s32 0, %v2049_v13  ;;  %v2055_v15 = vld [vmem:[%s2256_s2] sm:$0xf]  ;;  %1517 = vmatprep.subr.bf16.mxu0 %v1914_v26  ;;  %vm1915_vm1 = vmmov 0   ;;  %v1691_v27 = vld [vmem:[#allocation6 + $0x8] sm:$0xff]   ;;  %v1692_v28 = vld [vmem:[#allocation6 + $0x10] sm:$0xff]  }
  0x5f   :  { %v1690_v25 = vld [vmem:[#allocation6] sm:$0xff]   ;;  %1533 = vmatprep.mubr.msk.bf16.mxu0 %vm1915_vm1, %v1914_v26  ;;  %v1693_v29 = vld [vmem:[#allocation6 + $0x18] sm:$0xff]   ;;  %v1695_v31 = vld [vmem:[#allocation6 + $0x28] sm:$0xff]   ;;  %v130_v34 = vsub.s32 2, %v2049_v13  ;;  %vm1363_vm2 = vcmask 64512  }
  0x60   :  { %187 = vmatpush1.bf16.msra.mxu1 %v1683_v4  ;;  %v123_v16 = vrot.slane %v2055_v15, %v122_v14  ;;  %1518 = vmatpush3.bf16.msra.mxu0 %v1690_v25  ;;  %v1694_v30 = vld [vmem:[#allocation6 + $0x20] sm:$0xff]   ;;  %v1696_v32 = vld [vmem:[#allocation6 + $0x30] sm:$0xff]   ;;  %v1697_v33 = vld [vmem:[#allocation6 + $0x38] sm:$0xff]  }
  0x61   :  { %227 = vmatprep.subr.bf16.mxu1 %v1686_v7  ;;  %1519 = vmatprep.subr.bf16.mxu0 %v1914_v26  ;;  %v131_v35 = vrot.slane %v2055_v15, %v130_v34  ;;  %v1383_v62 = vld [vmem:[%s2257_s3] ss:$0 sm:$0xff]  ;;  %v1699_v34 = vld [vmem:[#allocation7 + $0x48] sm:$0xff]  }
  0x62   :  { %v1384_v1 = vld [vmem:[%s2258_s4] ss:$0 sm:$0xff] }
  0x63   :  { %1381 = vmatmul.mubr.msk.bf16.vlgmr.msra.gmra.mrb[0].mxu1 %vm180_vm0, %v109_v9 }
  0x64   :  { %228 = vmatpush1.bf16.msra.mxu1 %v1684_v8  ;;  %259 = vmatprep.mubr.bf16.mxu1 %v1913_v0 }
  0x65   :  { %229 = vmatprep.subr.bf16.mxu1 %v1689_v10  ;;  %1520 = vmatpush3.bf16.msra.mxu0 %v1691_v27 }
  0x66   :  { %1521 = vmatprep.subr.bf16.mxu0 %v1914_v26 }
  0x68   :  { %230 = vmatpush1.bf16.msra.mxu1 %v1687_v11 }
  0x69   :  { %1537 = vmatprep.subr.bf16.mxu1 %v1914_v26  ;;  %1522 = vmatpush3.bf16.msra.mxu0 %v1692_v28 }
  0x6a   :  { %1523 = vmatprep.subr.bf16.mxu0 %v1914_v26 }
  0x6b   :  { %1382 = vmatmul.mubr.msk.bf16.vlgmr.msra.gmra.mrb[4].mxu1 %vm180_vm0, %v109_v9 }
  0x6c   :  { %1553 = vmatprep.mubr.msk.bf16.mxu1 %vm1915_vm1, %v1914_v26 }
  0x6d   :  { %1524 = vmatpush3.bf16.msra.mxu0 %v1693_v29 }
  0x6e   :  { %1525 = vmatprep.subr.bf16.mxu0 %v1914_v26 }
  0x71   :  { %1526 = vmatpush3.bf16.msra.mxu0 %v1694_v30 }
  0x72   :  { %1527 = vmatprep.subr.bf16.mxu0 %v1914_v26 }
  0x75   :  { %1528 = vmatpush3.bf16.msra.mxu0 %v1695_v31 }
  0x76   :  { %1529 = vmatprep.subr.bf16.mxu0 %v1914_v26 }
  0x79   :  { %1530 = vmatpush3.bf16.msra.mxu0 %v1696_v32  ;;  %v1698_v32 = vld [vmem:[#allocation7 + $0x40] sm:$0xff]  }
  0x7a   :  { %1531 = vmatprep.subr.bf16.mxu0 %v1914_v26 }
  0x7d   :  { %1532 = vmatpush3.bf16.msra.mxu0 %v1697_v33 }
  0x7e   :  { %1557 = vmatprep.subr.bf16.mxu0 %v1914_v26 }
 0x136   :  { %v218_v17 = vpop.f32.mrb[0].mxu1 }
 0x137   :  { %v2058_v18 = vadd.f32 %v218_v17, %v123_v16  ;;  %v2060_v19 = vpop.f32.mrb[1].mxu1 }
 0x138   :  { %v222_v20 = vpop.f32.mrb[2].mxu1 }
 0x139   :  { %v2062_v21 = vadd.f32 %v222_v20, %v123_v16  ;;  %v2064_v22 = vpop.f32.mrb[3].mxu1  ;;  %272 = vadd.xlane.f32.xlu0 %v2058_v18  ;;  %v278_v23 = vmul.f32 %v2058_v18, %v2058_v18 }
 0x13b   :  { %280 = vadd.xlane.f32.xlu1 %v278_v23  ;;  %v279_v24 = vmul.f32 %v2062_v21, %v2062_v21 }
 0x13d   :  { %274 = vadd.xlane.f32.xlu0 %v2062_v21 }
 0x13e   :  { %v261_v36 = vpop.f32.mrb[4].mxu1 }
 0x13f   :  { %282 = vadd.xlane.f32.xlu1 %v279_v24  ;;  %v2088_v37 = vadd.f32 %v261_v36, %v131_v35  ;;  %v2090_v38 = vpop.f32.mrb[5].mxu1  ;;  %v1701_v36 = vld [vmem:[#allocation7 + $0x58] sm:$0xff]  }
 0x140   :  { %v265_v39 = vpop.f32.mrb[6].mxu1 }
 0x141   :  { %v2092_v40 = vadd.f32 %v265_v39, %v131_v35  ;;  %673 = vadd.xlane.f32.xlu0 %v2088_v37  ;;  %v679_v41 = vmul.f32 %v2088_v37, %v2088_v37  ;;  %v2100_v43 = vpop.f32.mrb[7].mxu1  ;;  %v1700_v35 = vld [vmem:[#allocation7 + $0x50] sm:$0xff]   ;;  %v1702_v39 = vld [vmem:[#allocation7 + $0x60] sm:$0xff]  }
 0x143   :  { %675 = vadd.xlane.f32.xlu1 %v2092_v40  ;;  %v680_v42 = vmul.f32 %v2092_v40, %v2092_v40 }
 0x145   :  { %681 = vadd.xlane.f32.xlu0 %v679_v41  ;;  %v1703_v41 = vld [vmem:[#allocation7 + $0x68] sm:$0xff]  }
 0x147   :  { %683 = vadd.xlane.f32.xlu1 %v680_v42  ;;  %v1704_v42 = vld [vmem:[#allocation7 + $0x70] sm:$0xff]  }
 0x1c6   :  { %v273_v44 = vpop.xlane.xlu0 %272 }
 0x1c7   :  { %v276_v45 = vmul.f32 0.0625, %v273_v44 }
 0x1c8   :  { %v281_v46 = vpop.xlane.xlu1 %280 }
 0x1c9   :  { %v286_v47 = vmul.f32 %v276_v45, %v276_v45  ;;  %v284_v48 = vmul.f32 0.0625, %v281_v46  ;;  %v292_v60 = vsub.f32 %v2058_v18, %v276_v45 }
 0x1ca   :  { %v275_v49 = vpop.xlane.xlu0 %274 }
 0x1cb   :  { %v288_v50 = vsub.f32 %v284_v48, %v286_v47  ;;  %v277_v51 = vmul.f32 0.0625, %v275_v49 }
 0x1cc   :  { %v283_v52 = vpop.xlane.xlu1 %282 }
 0x1cd   :  { %v290_v53 = vmax.f32 %v288_v50, 0.0  ;;  %v287_v54 = vmul.f32 %v277_v51, %v277_v51  ;;  %v285_v55 = vmul.f32 0.0625, %v283_v52  ;;  %v293_v2 = vsub.f32 %v2062_v21, %v277_v51 }
 0x1ce   :  { %v674_v44 = vpop.xlane.xlu0 %673 }
 0x1cf   :  { %v294_v56 = vadd.f32 1e-05, %v290_v53  ;;  %v289_v57 = vsub.f32 %v285_v55, %v287_v54  ;;  %v677_v45 = vmul.f32 0.0625, %v674_v44 }
 0x1d0   :  { %v676_v46 = vpop.xlane.xlu1 %675 }
 0x1d1   :  { %1746 = vrsqrt.f32 %v294_v56  ;;  %v291_v58 = vmax.f32 %v289_v57, 0.0  ;;  %v687_v47 = vmul.f32 %v677_v45, %v677_v45  ;;  %v678_v48 = vmul.f32 0.0625, %v676_v46 }
 0x1d2   :  { %v682_v49 = vpop.xlane.xlu0 %681 }
 0x1d3   :  { %v295_v59 = vadd.f32 1e-05, %v291_v58  ;;  %v688_v50 = vmul.f32 %v678_v48, %v678_v48  ;;  %v685_v51 = vmul.f32 0.0625, %v682_v49  ;;  %v1706_v49 = vld [vmem:[#allocation7] sm:$0xff]  }
 0x1d4   :  { %v684_v52 = vpop.xlane.xlu1 %683  ;;  %1538 = vmatpush3.bf16.msra.mxu1 %v1706_v49 }
 0x1d5   :  { %1748 = vrsqrt.f32 %v295_v59  ;;  %v689_v53 = vsub.f32 %v685_v51, %v687_v47  ;;  %v686_v54 = vmul.f32 0.0625, %v684_v52  ;;  %1539 = vmatprep.subr.bf16.mxu1 %v1914_v26  ;;  %v1710_v51 = vld [vmem:[#allocation7 + $0x20] sm:$0xff]   ;;  %v1711_v52 = vld [vmem:[#allocation7 + $0x28] sm:$0xff]  }
 0x1d7   :  { %v691_v55 = vmax.f32 %v689_v53, 0.0  ;;  %v690_v56 = vsub.f32 %v686_v54, %v688_v50  ;;  %v1709_v50 = vld [vmem:[#allocation7 + $0x18] sm:$0xff]   ;;  %v1712_v53 = vld [vmem:[#allocation7 + $0x30] sm:$0xff]  }
 0x1d8   :  { %v1713_v54 = vld [vmem:[#allocation7 + $0x38] sm:$0xff]  }
 0x1d9   :  { %v695_v57 = vadd.f32 1e-05, %v691_v55  ;;  %v692_v58 = vmax.f32 %v690_v56, 0.0 }
 0x1db   :  { %v1747_v61 = vpop.eup %1746  ;;  %v696_v59 = vadd.f32 1e-05, %v692_v58 }
 0x1dc   :  { %v298_v63 = vmul.f32 %v1747_v61, %v292_v60  ;;  %v693_v60 = vsub.f32 %v2088_v37, %v677_v45  ;;  %v694_v61 = vsub.f32 %v2092_v40, %v678_v48 }
 0x1de   :  { %v306_v3 = vmul.f32 %v1383_v62, %v298_v63  ;;  %v1405_v63 = vld [vmem:[%s2257_s3 + $0x2] ss:$0 sm:$0xff] }
 0x1df   :  { %v1749_v4 = vpop.eup %1748 }
 0x1e0   :  { %v299_v5 = vmul.f32 %v1749_v4, %v293_v2  ;;  %v314_v6 = vadd.f32 %v1384_v1, %v306_v3 }
 0x1e2   :  { %v307_v7 = vmul.f32 %v1383_v62, %v299_v5  ;;  %v316_v8 = vmul.f32 %v314_v6, %v314_v6 }
 0x1e4   :  { %v315_v9 = vadd.f32 %v1384_v1, %v307_v7  ;;  %v318_v10 = vmul.f32 %v316_v8, %v314_v6 }
 0x1e6   :  { %v317_v11 = vmul.f32 %v315_v9, %v315_v9  ;;  %v320_v12 = vmul.f32 0.044715, %v318_v10 }
 0x1e8   :  { %v319_v14 = vmul.f32 %v317_v11, %v315_v9  ;;  %v322_v16 = vadd.f32 %v320_v12, %v314_v6 }
 0x1ea   :  { %v321_v17 = vmul.f32 0.044715, %v319_v14  ;;  %v324_v18 = vmul.f32 0.7978846, %v322_v16 }
 0x1ec   :  { %v323_v20 = vadd.f32 %v321_v17, %v315_v9  ;;  %1750 = vtanh.f32 %v324_v18 }
 0x1ee   :  { %v325_v23 = vmul.f32 0.7978846, %v323_v20 }
 0x1f0   :  { %1752 = vtanh.f32 %v325_v23 }
 0x1f1   :  { %1754 = vrsqrt.f32 %v695_v57 }
 0x1f2   :  { %1756 = vrsqrt.f32 %v696_v59 }
 0x1f6   :  { %v1751_v24 = vpop.eup %1750 }
 0x1f7   :  { %v328_v21 = vadd.f32 1.0, %v1751_v24 }
 0x1f9   :  { %v330_v28 = vmul.f32 0.5, %v328_v21 }
 0x1fa   :  { %v1753_v25 = vpop.eup %1752 }
 0x1fb   :  { %v329_v27 = vadd.f32 1.0, %v1753_v25  ;;  %v332_v30 = vmul.f32 %v330_v28, %v314_v6  ;;  %v1755_v62 = vpop.eup %1754  ;;  %v1406_v6 = vld [vmem:[%s2258_s4 + $0x2] ss:$0 sm:$0xff] }
 0x1fc   :  { %v699_v1 = vmul.f32 %v1755_v62, %v693_v60  ;;  %v1757_v2 = vpop.eup %1756 }
 0x1fd   :  { %v331_v29 = vmul.f32 0.5, %v329_v27  ;;  %v700_v4 = vmul.f32 %v1757_v2, %v694_v61  ;;  %v1705_v27 = vld [vmem:[#allocation7 + $0x78] sm:$0xff]  }
 0x1fe   :  { %v707_v3 = vmul.f32 %v1405_v63, %v699_v1 }
 0x1ff   :  { %v333_v31 = vmul.f32 %v331_v29, %v315_v9  ;;  %v708_v5 = vmul.f32 %v1405_v63, %v700_v4 }
 0x200   :  { %v715_v7 = vadd.f32 %v1406_v6, %v707_v3 }
 0x201   :  { %v334_v33 = vpack.c.bf16 %v333_v31, %v332_v30  ;;  %v716_v8 = vadd.f32 %v1406_v6, %v708_v5 }
 0x202   :  { %v717_v9 = vmul.f32 %v715_v7, %v715_v7 }
 0x203   :  { %1534 = vmatmul.mubr.bf16.vlgmr.msra.gmra.mrb[0].mxu0 %v334_v33  ;;  %v718_v37 = vmul.f32 %v716_v8, %v716_v8  ;;  %v1385_v33 = vld [vmem:[%s2260_s6] ss:$0 sm:$0xff] }
 0x204   :  { %1558 = vmatpush3.bf16.msra.mxu0 %v1698_v32  ;;  %1573 = vmatprep.mubr.msk.bf16.mxu0 %vm1915_vm1, %v1914_v26  ;;  %v719_v10 = vmul.f32 %v717_v9, %v715_v7  ;;  %v126_v32 = vsub.s32 1, %v2049_v13  ;;  %v134_v9 = vsub.s32 3, %v2049_v13 }
 0x205   :  { %1559 = vmatprep.subr.bf16.mxu0 %v1914_v26  ;;  %v720_v40 = vmul.f32 %v718_v37, %v716_v8 }
 0x206   :  { %v721_v11 = vmul.f32 0.044715, %v719_v10 }
 0x207   :  { %v722_v12 = vmul.f32 0.044715, %v720_v40 }
 0x208   :  { %1560 = vmatpush3.bf16.msra.mxu0 %v1699_v34  ;;  %v723_v14 = vadd.f32 %v721_v11, %v715_v7 }
 0x209   :  { %1561 = vmatprep.subr.bf16.mxu0 %v1914_v26  ;;  %v724_v16 = vadd.f32 %v722_v12, %v716_v8 }
 0x20a   :  { %v725_v17 = vmul.f32 0.7978846, %v723_v14 }
 0x20b   :  { %v726_v18 = vmul.f32 0.7978846, %v724_v16  ;;  %v135_v16 = vrot.slane %v2055_v15, %v134_v9  ;;  %v1723_v9 = vld [vmem:[#allocation9 + $0x18] sm:$0xff]  }
 0x20c   :  { %1562 = vmatpush3.bf16.msra.mxu0 %v1700_v35  ;;  %1758 = vtanh.f32 %v725_v17  ;;  %v127_v35 = vrot.slane %v2055_v15, %v126_v32 }
 0x20d   :  { %1563 = vmatprep.subr.bf16.mxu0 %v1914_v26  ;;  %1760 = vtanh.f32 %v726_v18  ;;  %v2167_v13 = vadd.f32 %v2090_v38, %v135_v16 }
 0x20e   :  { %v2136_v45 = vadd.f32 %v2060_v19, %v127_v35  ;;  %v2139_v46 = vadd.f32 %v2064_v22, %v127_v35  ;;  %v1707_v19 = vld [vmem:[#allocation7 + $0x8] sm:$0xff]   ;;  %v1708_v22 = vld [vmem:[#allocation7 + $0x10] sm:$0xff]  }
 0x20f   :  { %1540 = vmatpush3.bf16.msra.mxu1 %v1707_v19  ;;  %v1064_v15 = vmul.f32 %v2167_v13, %v2167_v13  ;;  %v1916_v19 = vmov 1  }
 0x210   :  { %1564 = vmatpush3.bf16.msra.mxu0 %v1701_v36  ;;  %v473_v47 = vmul.f32 %v2136_v45, %v2136_v45  ;;  %v474_v48 = vmul.f32 %v2139_v46, %v2139_v46  ;;  %1541 = vmatprep.subr.bf16.mxu1 %v1914_v26 }
 0x211   :  { %1565 = vmatprep.subr.bf16.mxu0 %v1914_v26  ;;  %1673 = vset.pattern.permute.xlu0 %v1916_v19 }
 0x212   :  { %1674 = vset.pattern.permute.xlu1 %v1916_v19 }
 0x213   :  { %1542 = vmatpush3.bf16.msra.mxu1 %v1708_v22 }
 0x214   :  { %1566 = vmatpush3.bf16.msra.mxu0 %v1702_v39  ;;  %1543 = vmatprep.subr.bf16.mxu1 %v1914_v26 }
 0x215   :  { %1567 = vmatprep.subr.bf16.mxu0 %v1914_v26 }
 0x216   :  { %v1759_v20 = vpop.eup %1758 }
 0x217   :  { %v1761_v23 = vpop.eup %1760  ;;  %v729_v24 = vadd.f32 1.0, %v1759_v20  ;;  %1544 = vmatpush3.bf16.msra.mxu1 %v1709_v50 }
 0x218   :  { %1568 = vmatpush3.bf16.msra.mxu0 %v1703_v41  ;;  %v730_v21 = vadd.f32 1.0, %v1761_v23  ;;  %1545 = vmatprep.subr.bf16.mxu1 %v1914_v26 }
 0x219   :  { %1569 = vmatprep.subr.bf16.mxu0 %v1914_v26  ;;  %v731_v25 = vmul.f32 0.5, %v729_v24 }
 0x21a   :  { %v732_v28 = vmul.f32 0.5, %v730_v21  ;;  %v2171_v21 = vadd.f32 %v2100_v43, %v135_v16  ;;  %v1394_v43 = vld [vmem:[%s2257_s3 + $0x1] ss:$0 sm:$0xff]  ;;  %v1726_v16 = vld [vmem:[#allocation9 + $0x78] sm:$0xff]  }
 0x21b   :  { %v733_v29 = vmul.f32 %v731_v25, %v715_v7  ;;  %1546 = vmatpush3.bf16.msra.mxu1 %v1710_v51 }
 0x21c   :  { %1570 = vmatpush3.bf16.msra.mxu0 %v1704_v42  ;;  %v734_v30 = vmul.f32 %v732_v28, %v716_v8  ;;  %1547 = vmatprep.subr.bf16.mxu1 %v1914_v26  ;;  %v1065_v25 = vmul.f32 %v2171_v21, %v2171_v21 }
 0x21d   :  { %1571 = vmatprep.subr.bf16.mxu0 %v1914_v26 }
 0x21e   :  { %v735_v31 = vpack.c.bf16 %v734_v30, %v733_v29 }
 0x21f   :  { %1548 = vmatpush3.bf16.msra.mxu1 %v1711_v52 }
 0x220   :  { %1572 = vmatpush3.bf16.msra.mxu0 %v1705_v27  ;;  %1549 = vmatprep.subr.bf16.mxu1 %v1914_v26 }
 0x221   :  { %1597 = vmatprep.subr.bf16.mxu0 %v1914_v26 }
 0x223   :  { %1574 = vmatmul.mubr.bf16.vlgmr.msra.gmra.mrb[4].mxu0 %v735_v31  ;;  %1550 = vmatpush3.bf16.msra.mxu1 %v1712_v53  ;;  %v1395_v31 = vld [vmem:[%s2258_s4 + $0x1] ss:$0 sm:$0xff] }
 0x224   :  { %1613 = vmatprep.mubr.msk.bf16.mxu0 %vm1915_vm1, %v1914_v26  ;;  %1551 = vmatprep.subr.bf16.mxu1 %v1914_v26 }
 0x227   :  { %1552 = vmatpush3.bf16.msra.mxu1 %v1713_v54 }
 0x228   :  { %1577 = vmatprep.subr.bf16.mxu1 %v1914_v26 }
 0x2d6   :  { %v440_v34 = vpop.f32.mrb[0].mxu0 }
 0x2d7   :  { %v441_v36 = vadd.f32 %v1385_v33, %v440_v34  ;;  %v1535_v39 = vpop.f32.mrb[1].mxu0 }
 0x2d8   :  { %v443_v41 = vpop.f32.mrb[2].mxu0 }
 0x2d9   :  { %v444_v42 = vadd.f32 %v1385_v33, %v443_v41  ;;  %447 = vmax.xlane.f32.xlu0 %v441_v36  ;;  %v1536_v44 = vpop.f32.mrb[3].mxu0 }
 0x2db   :  { %449 = vmax.xlane.f32.xlu1 %v444_v42 }
 0x2dd   :  { %467 = vadd.xlane.f32.xlu0 %v2136_v45 }
 0x2df   :  { %469 = vadd.xlane.f32.xlu1 %v2139_v46 }
 0x2e1   :  { %475 = vadd.xlane.f32.xlu0 %v473_v47 }
 0x2e3   :  { %477 = vadd.xlane.f32.xlu1 %v474_v48 }
 0x2f6   :  { %v2155_v55 = vpop.f32.mrb[4].mxu0 }
 0x2f7   :  { %v1575_v56 = vpop.f32.mrb[5].mxu0 }
 0x2f8   :  { %v2157_v57 = vpop.f32.mrb[6].mxu0 }
 0x2f9   :  { %v1576_v58 = vpop.f32.mrb[7].mxu0 }
 0x366   :  { %v448_v59 = vpop.xlane.xlu0 %447 }
 0x367   :  { %v451_v60 = vsub.f32 %v441_v36, %v448_v59 }
 0x368   :  { %v450_v61 = vpop.xlane.xlu1 %449 }
 0x369   :  { %v453_v62 = vmul.f32 1.442695, %v451_v60  ;;  %v452_v63 = vsub.f32 %v444_v42, %v450_v61  ;;  %v1714_v61 = vld [vmem:[#allocation9 + $0x40] sm:$0xff]  }
 0x36a   :  { %v468_v1 = vpop.xlane.xlu0 %467 }
 0x36b   :  { %1762 = vpow2.f32 %v453_v62  ;;  %v455_v2 = vmul.f32 1.442695, %v452_v63  ;;  %v471_v3 = vmul.f32 0.0625, %v468_v1  ;;  %v1715_v62 = vld [vmem:[#allocation9 + $0x48] sm:$0xff]   ;;  %v1716_v63 = vld [vmem:[#allocation9 + $0x50] sm:$0xff]   ;;  %v1717_v1 = vld [vmem:[#allocation9] sm:$0xff]  }
 0x36c   :  { %v470_v4 = vpop.xlane.xlu1 %469  ;;  %1598 = vmatpush3.bf16.msra.mxu0 %v1717_v1 }
 0x36d   :  { %1764 = vpow2.f32 %v455_v2  ;;  %v472_v5 = vmul.f32 0.0625, %v470_v4  ;;  %v481_v7 = vmul.f32 %v471_v3, %v471_v3  ;;  %v487_v38 = vsub.f32 %v2136_v45, %v471_v3  ;;  %v1718_v2 = vld [vmem:[#allocation9 + $0x58] sm:$0xff]   ;;  %v1719_v3 = vld [vmem:[#allocation9 + $0x8] sm:$0xff]   ;;  %1599 = vmatprep.subr.bf16.mxu0 %v1914_v26 }
 0x36e   :  { %v476_v6 = vpop.xlane.xlu0 %475 }
 0x36f   :  { %v479_v8 = vmul.f32 0.0625, %v476_v6  ;;  %v482_v10 = vmul.f32 %v472_v5, %v472_v5  ;;  %v488_v28 = vsub.f32 %v2139_v46, %v472_v5  ;;  %v1720_v5 = vld [vmem:[#allocation9 + $0x60] sm:$0xff]   ;;  %v1721_v6 = vld [vmem:[#allocation9 + $0x10] sm:$0xff]  }
 0x370   :  { %v478_v37 = vpop.xlane.xlu1 %477  ;;  %1600 = vmatpush3.bf16.msra.mxu0 %v1719_v3 }
 0x371   :  { %v483_v40 = vsub.f32 %v479_v8, %v481_v7  ;;  %v480_v11 = vmul.f32 0.0625, %v478_v37  ;;  %1601 = vmatprep.subr.bf16.mxu0 %v1914_v26  ;;  %v1722_v8 = vld [vmem:[#allocation9 + $0x68] sm:$0xff]   ;;  %v1724_v37 = vld [vmem:[#allocation9 + $0x70] sm:$0xff]  }
 0x373   :  { %v485_v12 = vmax.f32 %v483_v40, 0.0  ;;  %v484_v14 = vsub.f32 %v480_v11, %v482_v10  ;;  %v1725_v11 = vld [vmem:[#allocation9 + $0x20] sm:$0xff]  }
 0x374   :  { %1602 = vmatpush3.bf16.msra.mxu0 %v1721_v6 }
 0x375   :  { %v2161_v17 = vpop.eup %1762  ;;  %v489_v18 = vadd.f32 1e-05, %v485_v12  ;;  %v486_v20 = vmax.f32 %v484_v14, 0.0  ;;  %1603 = vmatprep.subr.bf16.mxu0 %v1914_v26 }
 0x376   :  { %457 = vadd.xlane.f32.xlu0 %v2161_v17 }
 0x377   :  { %v2164_v23 = vpop.eup %1764  ;;  %1766 = vrsqrt.f32 %v489_v18  ;;  %v490_v24 = vadd.f32 1e-05, %v486_v20  ;;  %v1727_v18 = vld [vmem:[#allocation9 + $0x28] sm:$0xff]   ;;  %v1917_v20 = vmov 2  }
 0x378   :  { %459 = vadd.xlane.f32.xlu1 %v2164_v23  ;;  %1604 = vmatpush3.bf16.msra.mxu0 %v1723_v9  ;;  %v1396_v9 = vld [vmem:[%s2262_s8] ss:$0 sm:$0xff] }
 0x379   :  { %1768 = vrsqrt.f32 %v490_v24  ;;  %1605 = vmatprep.subr.bf16.mxu0 %v1914_v26 }
 0x37a   :  { %1058 = vadd.xlane.f32.xlu0 %v2167_v13 }
 0x37c   :  { %1060 = vadd.xlane.f32.xlu1 %v2171_v21  ;;  %1606 = vmatpush3.bf16.msra.mxu0 %v1725_v11 }
 0x37d   :  { %1607 = vmatprep.subr.bf16.mxu0 %v1914_v26 }
 0x37e   :  { %1066 = vadd.xlane.f32.xlu0 %v1064_v15 }
 0x380   :  { %1068 = vadd.xlane.f32.xlu1 %v1065_v25  ;;  %1608 = vmatpush3.bf16.msra.mxu0 %v1727_v18  ;;  %v1732_v18 = vld [vmem:[#allocation7 + $0x90] sm:$0xff]  }
 0x381   :  { %v1767_v27 = vpop.eup %1766  ;;  %1609 = vmatprep.subr.bf16.mxu0 %v1914_v26 }
 0x382   :  { %v493_v29 = vmul.f32 %v1767_v27, %v487_v38 }
 0x383   :  { %v1769_v30 = vpop.eup %1768 }
 0x384   :  { %v501_v32 = vmul.f32 %v1394_v43, %v493_v29  ;;  %v494_v33 = vmul.f32 %v1769_v30, %v488_v28 }
 0x386   :  { %v502_v34 = vmul.f32 %v1394_v43, %v494_v33  ;;  %v509_v35 = vadd.f32 %v1395_v31, %v501_v32 }
 0x388   :  { %v510_v36 = vadd.f32 %v1395_v31, %v502_v34  ;;  %v511_v39 = vmul.f32 %v509_v35, %v509_v35 }
 0x38a   :  { %v512_v41 = vmul.f32 %v510_v36, %v510_v36  ;;  %v513_v42 = vmul.f32 %v511_v39, %v509_v35 }
 0x38c   :  { %v514_v44 = vmul.f32 %v512_v41, %v510_v36  ;;  %v515_v45 = vmul.f32 0.044715, %v513_v42 }
 0x38e   :  { %v516_v47 = vmul.f32 0.044715, %v514_v44  ;;  %v517_v48 = vadd.f32 %v515_v45, %v509_v35 }
 0x390   :  { %v518_v49 = vadd.f32 %v516_v47, %v510_v36  ;;  %v519_v46 = vmul.f32 0.7978846, %v517_v48 }
 0x392   :  { %v520_v22 = vmul.f32 0.7978846, %v518_v49  ;;  %1770 = vtanh.f32 %v519_v46 }
 0x394   :  { %1772 = vtanh.f32 %v520_v22  ;;  %v1433_v22 = vld [vmem:[%s2257_s3 + $0x3] ss:$0 sm:$0xff] }
 0x39c   :  { %v1771_v50 = vpop.eup %1770 }
 0x39d   :  { %v523_v51 = vadd.f32 1.0, %v1771_v50 }
 0x39e   :  { %v1773_v52 = vpop.eup %1772 }
 0x39f   :  { %v524_v53 = vadd.f32 1.0, %v1773_v52  ;;  %v525_v54 = vmul.f32 0.5, %v523_v51  ;;  %v1434_v52 = vld [vmem:[%s2258_s4 + $0x3] ss:$0 sm:$0xff] }
 0x3a1   :  { %v526_v56 = vmul.f32 0.5, %v524_v53  ;;  %v527_v58 = vmul.f32 %v525_v54, %v509_v35 }
 0x3a3   :  { %v528_v59 = vmul.f32 %v526_v56, %v510_v36 }
 0x3a5   :  { %v529_v60 = vpack.c.bf16 %v528_v59, %v527_v58 }
 0x3a7   :  { %1554 = vmatmul.mubr.bf16.vlgmr.msra.gmra.mrb[8].mxu1 %v529_v60 }
 0x3a8   :  { %1578 = vmatpush3.bf16.msra.mxu1 %v1714_v61  ;;  %1593 = vmatprep.mubr.msk.bf16.mxu1 %vm1915_vm1, %v1914_v26 }
 0x3a9   :  { %1579 = vmatprep.subr.bf16.mxu1 %v1914_v26 }
 0x3ac   :  { %1580 = vmatpush3.bf16.msra.mxu1 %v1715_v62 }
 0x3ad   :  { %1581 = vmatprep.subr.bf16.mxu1 %v1914_v26 }
 0x3b0   :  { %1582 = vmatpush3.bf16.msra.mxu1 %v1716_v63 }
 0x3b1   :  { %1583 = vmatprep.subr.bf16.mxu1 %v1914_v26 }
 0x3b4   :  { %1584 = vmatpush3.bf16.msra.mxu1 %v1718_v2 }
 0x3b5   :  { %1585 = vmatprep.subr.bf16.mxu1 %v1914_v26 }
 0x3b8   :  { %1586 = vmatpush3.bf16.msra.mxu1 %v1720_v5  ;;  %v1728_v5 = vld [vmem:[#allocation7 + $0x80] sm:$0xff]  }
 0x3b9   :  { %1587 = vmatprep.subr.bf16.mxu1 %v1914_v26 }
 0x3bc   :  { %1588 = vmatpush3.bf16.msra.mxu1 %v1722_v8 }
 0x3bd   :  { %1589 = vmatprep.subr.bf16.mxu1 %v1914_v26 }
 0x3c0   :  { %1590 = vmatpush3.bf16.msra.mxu1 %v1724_v37 }
 0x3c1   :  { %1591 = vmatprep.subr.bf16.mxu1 %v1914_v26 }
 0x3c4   :  { %1592 = vmatpush3.bf16.msra.mxu1 %v1726_v16 }
 0x3c5   :  { %1617 = vmatprep.subr.bf16.mxu1 %v1914_v26 }
 0x403   :  { %v458_v4 = vpop.xlane.xlu0 %457 }
 0x404   :  { %1774 = vrcp.f32 %v458_v4 }
 0x405   :  { %v460_v7 = vpop.xlane.xlu1 %459 }
 0x406   :  { %1776 = vrcp.f32 %v460_v7 }
 0x407   :  { %v1059_v15 = vpop.xlane.xlu0 %1058 }
 0x408   :  { %v1062_v43 = vmul.f32 0.0625, %v1059_v15 }
 0x409   :  { %v1061_v24 = vpop.xlane.xlu1 %1060 }
 0x40a   :  { %v1063_v38 = vmul.f32 0.0625, %v1061_v24  ;;  %v1072_v30 = vmul.f32 %v1062_v43, %v1062_v43  ;;  %v1078_v47 = vsub.f32 %v2167_v13, %v1062_v43  ;;  %v1408_v13 = vld [vmem:[%s2262_s8 + $0x1] ss:$0 sm:$0xff]  ;;  %v1736_v43 = vld [vmem:[#allocation7 + $0xb0] sm:$0xff]  }
 0x40b   :  { %v1067_v27 = vpop.xlane.xlu0 %1066  ;;  %v844_v62 = vadd.f32 %v1408_v13, %v2155_v55  ;;  %v847_v63 = vadd.f32 %v1408_v13, %v2157_v57 }
 0x40c   :  { %v1073_v28 = vmul.f32 %v1063_v38, %v1063_v38  ;;  %v1070_v29 = vmul.f32 0.0625, %v1067_v27  ;;  %v1079_v41 = vsub.f32 %v2171_v21, %v1063_v38 }
 0x40d   :  { %v1069_v25 = vpop.xlane.xlu1 %1068 }
 0x40e   :  { %v1775_v10 = vpop.eup %1774  ;;  %v1074_v32 = vsub.f32 %v1070_v29, %v1072_v30  ;;  %v1737_v29 = vld [vmem:[#allocation7 + $0xb8] sm:$0xff]  }
 0x40f   :  { %v463_v40 = vmul.f32 %v1775_v10, %v2161_v17  ;;  %v1729_v17 = vld [vmem:[#allocation9 + $0x30] sm:$0xff]   ;;  %v1730_v10 = vld [vmem:[#allocation7 + $0x88] sm:$0xff]  }
 0x410   :  { %v1777_v12 = vpop.eup %1776  ;;  %1610 = vmatpush3.bf16.msra.mxu0 %v1729_v17  ;;  %v1076_v34 = vmax.f32 %v1074_v32, 0.0  ;;  %v1733_v17 = vld [vmem:[#allocation7 + $0x98] sm:$0xff]  }
 0x411   :  { %851 = vperm.xlu0 %1673, %v463_v40   ;;  %v464_v14 = vmul.f32 %v1777_v12, %v2164_v23  ;;  %1611 = vmatprep.subr.bf16.mxu0 %v1914_v26  ;;  %v1731_v23 = vld [vmem:[#allocation9 + $0x38] sm:$0xff]  }
 0x412   :  { %v1080_v36 = vadd.f32 1e-05, %v1076_v34  ;;  %v1739_v34 = vld [vmem:[#allocation9 + $0x88] sm:$0xff]  }
 0x413   :  { %855 = vperm.xlu1 %1674, %v464_v14  }
 0x414   :  { %1612 = vmatpush3.bf16.msra.mxu0 %v1731_v23  ;;  %v1734_v23 = vld [vmem:[#allocation7 + $0xa0] sm:$0xff]  }
 0x415   :  { %1677 = vset.pattern.permute.xlu0 %v1917_v20  ;;  %1637 = vmatprep.subr.bf16.mxu0 %v1914_v26 }
 0x417   :  { %1675 = vset.pattern.permute.xlu1 %v1913_v0  ;;  %v1071_v0 = vmul.f32 0.0625, %v1069_v25  ;;  %v1735_v25 = vld [vmem:[#allocation7 + $0xa8] sm:$0xff]  }
 0x418   :  { %644 = vperm.xlu1 %1675, %v463_v40  }
 0x419   :  { %v1075_v31 = vsub.f32 %v1071_v0, %v1073_v28 }
 0x41b   :  { %v1077_v33 = vmax.f32 %v1075_v31, 0.0 }
 0x41c   :  { %649 = vperm.xlu1 %1675, %v464_v14  }
 0x41d   :  { %v1081_v35 = vadd.f32 1e-05, %v1077_v33  ;;  %v1738_v33 = vld [vmem:[#allocation9 + $0x80] sm:$0xff]  }
 0x41f   :  { %1778 = vrsqrt.f32 %v1081_v35  ;;  %v1740_v35 = vld [vmem:[#allocation9 + $0x90] sm:$0xff]  }
 0x420   :  { %1676 = vset.pattern.permute.xlu1 %v1917_v20  ;;  %1780 = vrsqrt.f32 %v1080_v36  ;;  %v1741_v36 = vld [vmem:[#allocation9 + $0x98] sm:$0xff]  }
 0x421   :  { %1236 = vperm.xlu1 %1676, %v463_v40  }
 0x425   :  { %1240 = vperm.xlu1 %1676, %v464_v14  }
 0x429   :  { %v1779_v39 = vpop.eup %1778 }
 0x42a   :  { %v1781_v44 = vpop.eup %1780  ;;  %v1085_v48 = vmul.f32 %v1779_v39, %v1079_v41  ;;  %v1742_v39 = vld [vmem:[#allocation9 + $0xa0] sm:$0xff]   ;;  %v1743_v41 = vld [vmem:[#allocation9 + $0xa8] sm:$0xff]  }
 0x42b   :  { %v1084_v19 = vmul.f32 %v1781_v44, %v1078_v47  ;;  %v1745_v44 = vld [vmem:[#allocation9 + $0xb8] sm:$0xff]  }
 0x42c   :  { %v1093_v50 = vmul.f32 %v1433_v22, %v1085_v48 }
 0x42d   :  { %v1092_v51 = vmul.f32 %v1433_v22, %v1084_v19 }
 0x42e   :  { %v1101_v21 = vadd.f32 %v1434_v52, %v1093_v50 }
 0x42f   :  { %v1100_v53 = vadd.f32 %v1434_v52, %v1092_v51 }
 0x430   :  { %v1103_v54 = vmul.f32 %v1101_v21, %v1101_v21 }
 0x431   :  { %v1102_v56 = vmul.f32 %v1100_v53, %v1100_v53 }
 0x432   :  { %v1105_v58 = vmul.f32 %v1103_v54, %v1101_v21 }
 0x433   :  { %v1104_v59 = vmul.f32 %v1102_v56, %v1100_v53 }
 0x434   :  { %v1107_v61 = vmul.f32 0.044715, %v1105_v58 }
 0x435   :  { %v1106_v2 = vmul.f32 0.044715, %v1104_v59 }
 0x436   :  { %v1109_v6 = vadd.f32 %v1107_v61, %v1101_v21 }
 0x437   :  { %v1108_v8 = vadd.f32 %v1106_v2, %v1100_v53  ;;  %v1453_v2 = vld [vmem:[%s2264_s10] ss:$0 sm:$0xff] }
 0x438   :  { %v1111_v55 = vmul.f32 0.7978846, %v1109_v6 }
 0x439   :  { %v1110_v11 = vmul.f32 0.7978846, %v1108_v8 }
 0x43a   :  { %1782 = vtanh.f32 %v1111_v55 }
 0x43b   :  { %1784 = vtanh.f32 %v1110_v11 }
 0x444   :  { %v1783_v24 = vpop.eup %1782 }
 0x445   :  { %v1785_v15 = vpop.eup %1784  ;;  %v1115_v38 = vadd.f32 1.0, %v1783_v24 }
 0x446   :  { %v1114_v27 = vadd.f32 1.0, %v1785_v15 }
 0x447   :  { %v1117_v0 = vmul.f32 0.5, %v1115_v38 }
 0x448   :  { %v1116_v28 = vmul.f32 0.5, %v1114_v27 }
 0x449   :  { %v1119_v30 = vmul.f32 %v1117_v0, %v1101_v21 }
 0x44a   :  { %v1118_v31 = vmul.f32 %v1116_v28, %v1100_v53  ;;  %v1436_v53 = vld [vmem:[%s2262_s8 + $0x2] ss:$0 sm:$0xff] }
 0x44c   :  { %v1120_v32 = vpack.c.bf16 %v1119_v30, %v1118_v31 }
 0x47a   :  { %v635_v42 = vpop.f32.mrb[8].mxu1 }
 0x47b   :  { %v1555_v45 = vpop.f32.mrb[9].mxu1  ;;  %v636_v57 = vadd.f32 %v1396_v9, %v635_v42  ;;  %v1744_v42 = vld [vmem:[#allocation9 + $0xb0] sm:$0xff]  }
 0x47c   :  { %v638_v49 = vpop.f32.mrb[10].mxu1 }
 0x47d   :  { %v1556_v46 = vpop.f32.mrb[11].mxu1  ;;  %v639_v40 = vadd.f32 %v1396_v9, %v638_v49 }
 0x490   :  { %v852_v60 = vpop.permute.xlu0 %851 }
 0x491   :  { %v858_v3 = vmul.f32 %v852_v60, %v844_v62 }
 0x492   :  { %v856_v1 = vpop.permute.xlu1 %855 }
 0x493   :  { %v859_v4 = vmul.f32 %v856_v1, %v847_v63 }
 0x495   :  { %v860_v7 = vpack.c.bf16 %v859_v4, %v858_v3 }
 0x497   :  { %1594 = vmatmul.mubr.bf16.vlgmr.msra.gmra.mrb[12].mxu1 %v860_v7  ;;  %v645_v37 = vpop.permute.xlu1 %644 }
 0x498   :  { %1618 = vmatpush3.bf16.msra.mxu1 %v1728_v5  ;;  %1633 = vmatprep.mubr.msk.bf16.mxu1 %vm1915_vm1, %v1914_v26  ;;  %v652_v14 = vmul.f32 %v645_v37, %v636_v57 }
 0x499   :  { %1619 = vmatprep.subr.bf16.mxu1 %v1914_v26 }
 0x49b   :  { %v650_v12 = vpop.permute.xlu1 %649 }
 0x49c   :  { %1620 = vmatpush3.bf16.msra.mxu1 %v1730_v10  ;;  %v653_v16 = vmul.f32 %v650_v12, %v639_v40 }
 0x49d   :  { %1621 = vmatprep.subr.bf16.mxu1 %v1914_v26 }
 0x49e   :  { %v654_v20 = vpack.c.bf16 %v653_v16, %v652_v14 }
 0x4a0   :  { %1622 = vmatpush3.bf16.msra.mxu1 %v1732_v18  ;;  %1614 = vmatmul.mubr.bf16.vlgmr.msra.gmra.mrb[8].mxu0 %v654_v20  ;;  %v1237_v21 = vpop.permute.xlu1 %1236 }
 0x4a1   :  { %1623 = vmatprep.subr.bf16.mxu1 %v1914_v26  ;;  %1653 = vmatprep.mubr.msk.bf16.mxu0 %vm1915_vm1, %v1914_v26 }
 0x4a2   :  { %1638 = vmatpush3.bf16.msra.mxu0 %v1738_v33 }
 0x4a3   :  { %1639 = vmatprep.subr.bf16.mxu0 %v1914_v26 }
 0x4a4   :  { %1624 = vmatpush3.bf16.msra.mxu1 %v1733_v17  ;;  %v1241_v60 = vpop.permute.xlu1 %1240 }
 0x4a5   :  { %1625 = vmatprep.subr.bf16.mxu1 %v1914_v26 }
 0x4a6   :  { %1640 = vmatpush3.bf16.msra.mxu0 %v1739_v34 }
 0x4a7   :  { %1641 = vmatprep.subr.bf16.mxu0 %v1914_v26 }
 0x4a8   :  { %1626 = vmatpush3.bf16.msra.mxu1 %v1734_v23 }
 0x4a9   :  { %1627 = vmatprep.subr.bf16.mxu1 %v1914_v26 }
 0x4aa   :  { %1642 = vmatpush3.bf16.msra.mxu0 %v1740_v35 }
 0x4ab   :  { %1643 = vmatprep.subr.bf16.mxu0 %v1914_v26 }
 0x4ac   :  { %1628 = vmatpush3.bf16.msra.mxu1 %v1735_v25 }
 0x4ad   :  { %1629 = vmatprep.subr.bf16.mxu1 %v1914_v26 }
 0x4ae   :  { %1644 = vmatpush3.bf16.msra.mxu0 %v1741_v36 }
 0x4af   :  { %1645 = vmatprep.subr.bf16.mxu0 %v1914_v26 }
 0x4b0   :  { %1630 = vmatpush3.bf16.msra.mxu1 %v1736_v43 }
 0x4b1   :  { %1631 = vmatprep.subr.bf16.mxu1 %v1914_v26 }
 0x4b2   :  { %1646 = vmatpush3.bf16.msra.mxu0 %v1742_v39 }
 0x4b3   :  { %1647 = vmatprep.subr.bf16.mxu0 %v1914_v26 }
 0x4b4   :  { %1632 = vmatpush3.bf16.msra.mxu1 %v1737_v29 }
 0x4b6   :  { %1648 = vmatpush3.bf16.msra.mxu0 %v1743_v41 }
 0x4b7   :  { %1634 = vmatmul.mubr.bf16.vlgmr.msra.gmra.mrb[16].mxu1 %v1120_v32  ;;  %1649 = vmatprep.subr.bf16.mxu0 %v1914_v26 }
 0x4ba   :  { %1650 = vmatpush3.bf16.msra.mxu0 %v1744_v42 }
 0x4bb   :  { %1651 = vmatprep.subr.bf16.mxu0 %v1914_v26 }
 0x4be   :  { %1652 = vmatpush3.bf16.msra.mxu0 %v1745_v44 }
 0x56a   :  { %v960_v45 = vpop.f32.mrb[12].mxu1 }
 0x56b   :  { %v1595_v47 = vpop.f32.mrb[13].mxu1 }
 0x56c   :  { %v963_v48 = vpop.f32.mrb[14].mxu1 }
 0x56d   :  { %v1596_v49 = vpop.f32.mrb[15].mxu1 }
 0x573   :  { %v1049_v46 = vpop.f32.mrb[8].mxu0 }
 0x574   :  { %v1050_v19 = vadd.f32 %v1049_v46, %v960_v45  ;;  %v1615_v22 = vpop.f32.mrb[9].mxu0 }
 0x575   :  { %v1052_v50 = vpop.f32.mrb[10].mxu0 }
 0x576   :  { %v1053_v51 = vadd.f32 %v1052_v50, %v963_v48  ;;  %v1616_v52 = vpop.f32.mrb[11].mxu0 }
 0x58a   :  { %v1228_v54 = vpop.f32.mrb[16].mxu1 }
 0x58b   :  { %v1229_v56 = vadd.f32 %v1436_v53, %v1228_v54  ;;  %v1635_v26 = vpop.f32.mrb[17].mxu1 }
 0x58c   :  { %v1231_v58 = vpop.f32.mrb[18].mxu1 }
 0x58d   :  { %v1232_v13 = vadd.f32 %v1436_v53, %v1231_v58  ;;  %v1636_v59 = vpop.f32.mrb[19].mxu1  ;;  %v1243_v61 = vmul.f32 %v1237_v21, %v1229_v56 }
 0x58f   :  { %v1244_v62 = vmul.f32 %v1241_v60, %v1232_v13 }
 0x591   :  { %v1245_v63 = vpack.c.bf16 %v1244_v62, %v1243_v61 }
 0x593   :  { %1654 = vmatmul.mubr.bf16.vlgmr.msra.gmra.mrb[12].mxu0 %v1245_v63 }
 0x666   :  { %v1345_v1 = vpop.f32.mrb[12].mxu0 }
 0x667   :  { %v1352_v3 = vadd.f32 %v1345_v1, %v1050_v19  ;;  %v1655_v4 = vpop.f32.mrb[13].mxu0 }
 0x668   :  { %v1348_v5 = vpop.f32.mrb[14].mxu0 }
 0x669   :  { %v1361_v6 = vadd.f32 %v1453_v2, %v1352_v3  ;;  %v1353_v7 = vadd.f32 %v1348_v5, %v1053_v51  ;;  %v1656_v8 = vpop.f32.mrb[15].mxu0 }
 0x66b   :  { %1364 = vst.msk [vmem:[%s2265_s11] sm:$0xff] %vm1363_vm2, %v1361_v6  ;;  %v1362_v9 = vadd.f32 %v1453_v2, %v1353_v7 }
 0x66d   :  { %1365 = vst.msk [vmem:[%s2265_s11 + $0x8] sm:$0xff] %vm1363_vm2, %v1362_v9 }
 0x66e   :  { %1370 = vsyncpa [#allocation3], 1 }
 0x66f   :  { %1371 = vsyncpa [#allocation5], 1 }
 0x670   :  { %1372 = vsyncpa [#allocation8], 1 }

</bundles_post_ra>
